<compile_context>
chip_gen: v7x
topology: tpu7x:2x2x1
jax: 0.10.0
libtpu: 0.0.40
codegen_flags: <defaults>
</compile_context>

<pallas_src>
import functools

import numpy as np
import jax
import jax.numpy as jnp
from jax.experimental import pallas as pl
from jax.experimental.pallas import tpu as pltpu

# ----------------------------- configuration --------------------------------
B = 2            # batch
L = 16           # decoder sequence length
S = 16           # encoder (cross) sequence length
D_MODEL = 32
N_HEADS = 4
D_HEAD = D_MODEL // N_HEADS
D_FF = 4 * D_MODEL
MOVING_AVG = 5   # must be odd so series_decomp preserves the sequence length
assert MOVING_AVG % 2 == 1, "series_decomp requires an odd moving_avg kernel"


# ------------------------------- fused kernel --------------------------------
def _decoder_layer_kernel(
    x_ref, cross_ref, r_ref, smask_ref, cmask_ref,
    wqkv_s_ref, bqkv_s_ref, wo_s_ref, bo_s_ref,
    wq_c_ref, bq_c_ref, wkv_c_ref, bkv_c_ref, wo_c_ref, bo_c_ref,
    w1_ref, b1_ref, w2_ref, b2_ref,
    o_ref,
    *, n_heads, d_head, d_model,
):
    f32 = jnp.float32
    bf16 = jnp.bfloat16
    scale = 1.0 / (d_head ** 0.5)

    x = x_ref[...].astype(f32)        # [M,  D]  (M  = B*L, batch folded into rows)
    cross = cross_ref[...].astype(f32)  # [Mc, D]  (Mc = B*S)
    r = r_ref[...]                    # [M, M] bf16 block-diag (I - moving_avg)
    smask = smask_ref[...]            # [M, M]  f32 additive mask (0 / -1e9)
    cmask = cmask_ref[...]            # [M, Mc] f32 additive mask

    def mm(a_f32, w_bf16):
        # bf16 MXU operands, f32 accumulation.
        return jnp.dot(a_f32.astype(bf16), w_bf16, preferred_element_type=f32)

    def decomp(z):
        # series_decomp residual z - moving_avg(z) as ONE matmul with the
        # precomputed block-diagonal R = I - A.
        return jnp.dot(r, z.astype(bf16), preferred_element_type=f32)

    def attention(q, k, v, mask, wo, bo):
        # q: [Mq, D], k/v: [Mk, D].  Batch isolation via the additive mask, so
        # the MXU always sees the full M = B*L / B*S rows.  Heads are the same
        # contiguous d_head-wide slices as PyTorch's .view(B, L, H, -1).
        # Per-head epilogue is reassociated as p @ (v_h @ Wo_h) so nothing
        # narrower than D lanes is ever produced by the MXU.
        qb = q.astype(bf16)
        kb = k.astype(bf16)
        vb = v.astype(bf16)
        out = None
        for h in range(n_heads):          # static, fully unrolled (4 heads)
            lo = h * d_head
            qh = qb[:, lo:lo + d_head]
            kh = kb[:, lo:lo + d_head]
            vh = vb[:, lo:lo + d_head]
            # Independent of the softmax -> MXU overlaps with exp (EUP).
            vwo = jnp.dot(vh, wo[lo:lo + d_head, :],
                          preferred_element_type=f32)          # [Mk, D]
            # q_h @ k_h^T without an explicit transpose (contract last dims).
            s = jax.lax.dot_general(qh, kh, (((1,), (1,)), ((), ())),
                                    preferred_element_type=f32)
            s = s * scale + mask
            s = s - jnp.max(s, axis=-1, keepdims=True)
            p = jnp.exp(s)
            p = p * pl.reciprocal(jnp.sum(p, axis=-1, keepdims=True),
                                  approx=True)
            contrib = jnp.dot(p.astype(bf16), vwo.astype(bf16),
                              preferred_element_type=f32)       # [Mq, D]
            out = contrib if out is None else out + contrib
        return out + bo

    # ---------------- self attention + decomp1 ----------------
    qkv = mm(x, wqkv_s_ref[...]) + bqkv_s_ref[...]        # [M, 3D] fused QKV
    q = qkv[:, 0:d_model]
    k = qkv[:, d_model:2 * d_model]
    v = qkv[:, 2 * d_model:3 * d_model]
    a = attention(q, k, v, smask, wo_s_ref[...], bo_s_ref[...])
    x = decomp(x + a)

    # ---------------- cross attention + decomp2 ----------------
    q = mm(x, wq_c_ref[...]) + bq_c_ref[...]              # [M, D]
    kv = mm(cross, wkv_c_ref[...]) + bkv_c_ref[...]       # [Mc, 2D] fused KV
    k = kv[:, 0:d_model]
    v = kv[:, d_model:2 * d_model]
    a = attention(q, k, v, cmask, wo_c_ref[...], bo_c_ref[...])
    x = decomp(x + a)

    # ---------------- position-wise FFN (1x1 convs) + decomp3 ----------------
    h = jnp.maximum(mm(x, w1_ref[...]) + b1_ref[...], 0.0)   # [M, D_FF]
    y = mm(h, w2_ref[...]) + b2_ref[...]                     # [M, D]
    x = decomp(x + y)

    o_ref[...] = x.astype(o_ref.dtype)                       # one lane-dense slab


# ------------------------------ host helpers ----------------------------------
def moving_average_matrix(seq_len, ksize):
    """[L, L] matrix implementing PyTorch series_decomp's edge-replicated
    moving average: mean = A @ x."""
    pad = (ksize - 1) // 2
    a = np.zeros((seq_len, seq_len), np.float32)
    for i in range(seq_len):
        for off in range(-pad, pad + 1):
            j = min(max(i + off, 0), seq_len - 1)
            a[i, j] += 1.0 / ksize
    return a


def decoder_layer(x, cross, params):
    """Fused DecoderLayer forward (dropout = identity, activation = relu)."""
    b, l, d = x.shape
    s = cross.shape[1]
    m, mc = b * l, b * s
    d_ff = params["w1"].shape[1]
    bf16 = jnp.bfloat16

    # Weights as bf16 MXU operands (biases stay f32, added on the VPU).
    weights = (
        params["self_wqkv"].astype(bf16), params["self_bqkv"],
        params["self_wo"].astype(bf16), params["self_bo"],
        params["cross_wq"].astype(bf16), params["cross_bq"],
        params["cross_wkv"].astype(bf16), params["cross_bkv"],
        params["cross_wo"].astype(bf16), params["cross_bo"],
        params["w1"].astype(bf16), params["b1"],
        params["w2"].astype(bf16), params["b2"],
    )
    args = (x.reshape(m, d), cross.reshape(mc, d),
            params["r"], params["self_mask"], params["cross_mask"]) + weights

    kern = functools.partial(_decoder_layer_kernel,
                             n_heads=N_HEADS, d_head=D_HEAD, d_model=d)

    # Advisory cost estimate so XLA can overlap surrounding ops.
    flops = 2 * (
        m * d * 3 * d                                                  # self QKV
        + N_HEADS * (m * m * D_HEAD + m * D_HEAD * d + m * m * d)      # self attn
        + m * d * d + mc * d * 2 * d                                   # cross Q, KV
        + N_HEADS * (m * mc * D_HEAD + mc * D_HEAD * d + m * mc * d)   # cross attn
        + m * d * d_ff + m * d_ff * d                                  # FFN
        + 3 * m * m * d)                                               # 3x decomp
    transcendentals = N_HEADS * (m * m + m * mc) + 2 * N_HEADS * m
    bytes_accessed = (sum(int(np.prod(a.shape)) * a.dtype.itemsize for a in args)
                      + m * d * x.dtype.itemsize)

    vmem = pl.BlockSpec(memory_space=pltpu.MemorySpace.VMEM)
    out = pl.pallas_call(
        kern,
        out_shape=jax.ShapeDtypeStruct((m, d), x.dtype),
        in_specs=[vmem] * len(args),
        out_specs=vmem,
        cost_estimate=pl.CostEstimate(flops=flops,
                                      transcendentals=transcendentals,
                                      bytes_accessed=bytes_accessed),
    )(*args)
    return out.reshape(b, l, d)


# --------------------------- parameter init -----------------------------------
def init_params(key):
    def proj(k, fan_in, fan_out):
        return jax.random.normal(k, (fan_in, fan_out), jnp.float32) * (fan_in ** -0.5)

    def bias(k, n):
        return jax.random.normal(k, (1, n), jnp.float32) * 0.02

    keys = jax.random.split(key, 17)
    d = D_MODEL

    avg = moving_average_matrix(L, MOVING_AVG)               # np [L, L]
    r_block = np.eye(L, dtype=np.float32) - avg              # I - A
    r_full = np.zeros((B * L, B * L), np.float32)
    for i in range(B):
        r_full[i * L:(i + 1) * L, i * L:(i + 1) * L] = r_block

    def additive_block_mask(lq, lk):
        mval = np.full((B * lq, B * lk), -1e9, np.float32)
        for i in range(B):
            mval[i * lq:(i + 1) * lq, i * lk:(i + 1) * lk] = 0.0
        return jnp.asarray(mval)

    params = dict(
        # self-attention: fused QKV weight [D, 3D]
        self_wqkv=jnp.concatenate(
            [proj(keys[0], d, d), proj(keys[1], d, d), proj(keys[2], d, d)], axis=1),
        self_bqkv=bias(keys[10], 3 * d),
        self_wo=proj(keys[3], d, d),
        self_bo=bias(keys[11], d),
        # cross-attention: Q from x, fused KV [D, 2D] from `cross`
        cross_wq=proj(keys[4], d, d),
        cross_bq=bias(keys[12], d),
        cross_wkv=jnp.concatenate(
            [proj(keys[5], d, d), proj(keys[6], d, d)], axis=1),
        cross_bkv=bias(keys[13], 2 * d),
        cross_wo=proj(keys[7], d, d),
        cross_bo=bias(keys[14], d),
        # conv1: Conv1d(d_model, d_ff, 1) stored transposed as [D, D_FF]
        w1=proj(keys[8], d, D_FF),
        b1=bias(keys[15], D_FF),
        # conv2: Conv1d(d_ff, d_model, 1) stored as [D_FF, D]
        w2=proj(keys[9], D_FF, d),
        b2=bias(keys[16], d),
        # precomputed decomp / mask constants
        avg_f32=jnp.asarray(avg),
        r=jnp.asarray(r_full).astype(jnp.bfloat16),
        self_mask=additive_block_mask(L, L),
        cross_mask=additive_block_mask(L, S),
    )
    return params


# --------------------------- pure-JAX references --------------------------------
def decoder_layer_ref_f32(x, cross, params):
    """Natural full-f32 reference matching the PyTorch module semantics."""
    d = D_MODEL
    avg = params["avg_f32"]

    def decomp(z):
        return z - jnp.einsum("ij,bjd->bid", avg, z)

    def heads_attn(q, k, v):
        b, lq, _ = q.shape
        lk = k.shape[1]
        qh = q.reshape(b, lq, N_HEADS, D_HEAD).transpose(0, 2, 1, 3)
        kh = k.reshape(b, lk, N_HEADS, D_HEAD).transpose(0, 2, 1, 3)
        vh = v.reshape(b, lk, N_HEADS, D_HEAD).transpose(0, 2, 1, 3)
        sc = jnp.einsum("bhqd,bhkd->bhqk", qh, kh) / jnp.sqrt(float(D_HEAD))
        p = jax.nn.softmax(sc, axis=-1)
        o = jnp.einsum("bhqk,bhkd->bhqd", p, vh)
        return o.transpose(0, 2, 1, 3).reshape(b, lq, d)

    qkv = x @ params["self_wqkv"] + params["self_bqkv"]
    q, k, v = qkv[..., :d], qkv[..., d:2 * d], qkv[..., 2 * d:]
    a = heads_attn(q, k, v) @ params["self_wo"] + params["self_bo"]
    x = decomp(x + a)

    q = x @ params["cross_wq"] + params["cross_bq"]
    kv = cross @ params["cross_wkv"] + params["cross_bkv"]
    k, v = kv[..., :d], kv[..., d:]
    a = heads_attn(q, k, v) @ params["cross_wo"] + params["cross_bo"]
    x = decomp(x + a)

    h = jnp.maximum(x @ params["w1"] + params["b1"], 0.0)
    y = h @ params["w2"] + params["b2"]
    return decomp(x + y)


def decoder_layer_ref_matched(x, cross, params):
    """Precision-matched reference: bf16 MXU operands / f32 element-wise math,
    same dot association as the kernel, written in the natural per-batch form."""
    bf16 = jnp.bfloat16
    d = D_MODEL
    r = (jnp.eye(L, dtype=jnp.float32) - params["avg_f32"]).astype(bf16)

    def decomp(z):
        return jnp.einsum("ij,bjd->bid", r, z.astype(bf16),
                          preferred_element_type=jnp.float32)

    def bdot(a, w):
        return jnp.einsum("bld,de->ble", a.astype(bf16), w.astype(bf16),
                          preferred_element_type=jnp.float32)

    def attn(q, k, v, wo, bo):
        out = 0.0
        for h in range(N_HEADS):
            lo = h * D_HEAD
            qh, kh, vh = (t[..., lo:lo + D_HEAD].astype(bf16) for t in (q, k, v))
            s = jnp.einsum("bqd,bkd->bqk", qh, kh,
                           preferred_element_type=jnp.float32) / (D_HEAD ** 0.5)
            p = jax.nn.softmax(s, axis=-1)
            vwo = jnp.einsum("bkd,de->bke", vh, wo[lo:lo + D_HEAD, :].astype(bf16),
                             preferred_element_type=jnp.float32)
            out = out + jnp.einsum("bqk,bkd->bqd", p.astype(bf16),
                                   vwo.astype(bf16),
                                   preferred_element_type=jnp.float32)
        return out + bo

    qkv = bdot(x, params["self_wqkv"]) + params["self_bqkv"]
    q, k, v = qkv[..., :d], qkv[..., d:2 * d], qkv[..., 2 * d:]
    a = attn(q, k, v, params["self_wo"], params["self_bo"])
    x = decomp(x + a)

    q = bdot(x, params["cross_wq"]) + params["cross_bq"]
    kv = bdot(cross, params["cross_wkv"]) + params["cross_bkv"]
    k, v = kv[..., :d], kv[..., d:]
    a = attn(q, k, v, params["cross_wo"], params["cross_bo"])
    x = decomp(x + a)

    h = jnp.maximum(bdot(x, params["w1"]) + params["b1"], 0.0)
    y = bdot(h, params["w2"]) + params["b2"]
    return decomp(x + y)


# --------------------------------- main ----------------------------------------
if __name__ == "__main__":
    key = jax.random.PRNGKey(0)
    k_param, k_x, k_cross = jax.random.split(key, 3)

    params = init_params(k_param)
    x = jax.random.normal(k_x, (B, L, D_MODEL), jnp.float32)
    cross = jax.random.normal(k_cross, (B, S, D_MODEL), jnp.float32)

    out = jax.jit(decoder_layer)(x, cross, params)
    out = jax.block_until_ready(out)
    assert out.shape == (B, L, D_MODEL), out.shape
    assert bool(jnp.all(jnp.isfinite(out)))

    # Tight check against a reference with the same bf16-operand precision path.
    ref_m = decoder_layer_ref_matched(x, cross, params)
    err_m = float(jnp.max(jnp.abs(out - ref_m)))
    assert bool(jnp.allclose(out, ref_m, atol=2e-2, rtol=2e-2)), err_m

    # Coarse structural check against the full-f32 module semantics
    # (looser tolerance accounts for bf16 MXU operand rounding).
    ref_f = decoder_layer_ref_f32(x, cross, params)
    err_f = float(jnp.max(jnp.abs(out - ref_f)))
    assert bool(jnp.allclose(out, ref_f, atol=0.15, rtol=0.15)), err_f

    print("KERNEL_OK")
</pallas_src>

<mosaic_0001>
module attributes {stable_mosaic.version = 11 : i64} {
  func.func @_decoder_layer_kernel(%arg0: memref<32x32xf32, #tpu.memory_space<vmem>>, %arg1: memref<32x32xf32, #tpu.memory_space<vmem>>, %arg2: memref<32x32xbf16, #tpu.memory_space<vmem>>, %arg3: memref<32x32xf32, #tpu.memory_space<vmem>>, %arg4: memref<32x32xf32, #tpu.memory_space<vmem>>, %arg5: memref<32x96xbf16, #tpu.memory_space<vmem>>, %arg6: memref<1x96xf32, #tpu.memory_space<vmem>>, %arg7: memref<32x32xbf16, #tpu.memory_space<vmem>>, %arg8: memref<1x32xf32, #tpu.memory_space<vmem>>, %arg9: memref<32x32xbf16, #tpu.memory_space<vmem>>, %arg10: memref<1x32xf32, #tpu.memory_space<vmem>>, %arg11: memref<32x64xbf16, #tpu.memory_space<vmem>>, %arg12: memref<1x64xf32, #tpu.memory_space<vmem>>, %arg13: memref<32x32xbf16, #tpu.memory_space<vmem>>, %arg14: memref<1x32xf32, #tpu.memory_space<vmem>>, %arg15: memref<32x128xbf16, #tpu.memory_space<vmem>>, %arg16: memref<1x128xf32, #tpu.memory_space<vmem>>, %arg17: memref<128x32xbf16, #tpu.memory_space<vmem>>, %arg18: memref<1x32xf32, #tpu.memory_space<vmem>>, %arg19: memref<32x32xf32, #tpu.memory_space<vmem>>) attributes {dimension_semantics = [], scalar_prefetch = 0 : i64, scratch_operands = 0 : i64, tpu.core_type = #tpu.core_type<tc>} {
    %c0 = arith.constant 0 : index
    %c0_0 = arith.constant 0 : index
    %0 = vector.load %arg0[%c0, %c0_0] : memref<32x32xf32, #tpu.memory_space<vmem>>, vector<32x32xf32>
    %c0_1 = arith.constant 0 : index
    %c0_2 = arith.constant 0 : index
    %1 = vector.load %arg1[%c0_1, %c0_2] : memref<32x32xf32, #tpu.memory_space<vmem>>, vector<32x32xf32>
    %c0_3 = arith.constant 0 : index
    %c0_4 = arith.constant 0 : index
    %2 = vector.load %arg2[%c0_3, %c0_4] : memref<32x32xbf16, #tpu.memory_space<vmem>>, vector<32x32xbf16>
    %c0_5 = arith.constant 0 : index
    %c0_6 = arith.constant 0 : index
    %3 = vector.load %arg3[%c0_5, %c0_6] : memref<32x32xf32, #tpu.memory_space<vmem>>, vector<32x32xf32>
    %c0_7 = arith.constant 0 : index
    %c0_8 = arith.constant 0 : index
    %4 = vector.load %arg4[%c0_7, %c0_8] : memref<32x32xf32, #tpu.memory_space<vmem>>, vector<32x32xf32>
    %c0_9 = arith.constant 0 : index
    %c0_10 = arith.constant 0 : index
    %5 = vector.load %arg5[%c0_9, %c0_10] : memref<32x96xbf16, #tpu.memory_space<vmem>>, vector<32x96xbf16>
    %6 = arith.truncf %0 : vector<32x32xf32> to vector<32x32xbf16>
    %cst = arith.constant dense<0.000000e+00> : vector<32x96xf32>
    %7 = tpu.matmul %6, %5, %cst {dimension_numbers = #tpu.dot_dimension_numbers<[1], [0], [0], [1], [0, 0, 1, 1], [], []>} : vector<32x32xbf16>, vector<32x96xbf16>, vector<32x96xf32> -> vector<32x96xf32>
    %c0_11 = arith.constant 0 : index
    %c0_12 = arith.constant 0 : index
    %8 = vector.load %arg6[%c0_11, %c0_12] : memref<1x96xf32, #tpu.memory_space<vmem>>, vector<1x96xf32>
    %9 = vector.broadcast %8 : vector<1x96xf32> to vector<32x96xf32>
    %10 = arith.addf %7, %9 : vector<32x96xf32>
    %11 = vector.extract_strided_slice %10 {offsets = [0, 0], sizes = [32, 32], strides = [1, 1]} : vector<32x96xf32> to vector<32x32xf32>
    %12 = vector.extract_strided_slice %10 {offsets = [0, 32], sizes = [32, 32], strides = [1, 1]} : vector<32x96xf32> to vector<32x32xf32>
    %13 = vector.extract_strided_slice %10 {offsets = [0, 64], sizes = [32, 32], strides = [1, 1]} : vector<32x96xf32> to vector<32x32xf32>
    %c0_13 = arith.constant 0 : index
    %c0_14 = arith.constant 0 : index
    %14 = vector.load %arg7[%c0_13, %c0_14] : memref<32x32xbf16, #tpu.memory_space<vmem>>, vector<32x32xbf16>
    %c0_15 = arith.constant 0 : index
    %c0_16 = arith.constant 0 : index
    %15 = vector.load %arg8[%c0_15, %c0_16] : memref<1x32xf32, #tpu.memory_space<vmem>>, vector<1x32xf32>
    %16 = arith.truncf %11 : vector<32x32xf32> to vector<32x32xbf16>
    %17 = arith.truncf %12 : vector<32x32xf32> to vector<32x32xbf16>
    %18 = arith.truncf %13 : vector<32x32xf32> to vector<32x32xbf16>
    %19 = vector.extract_strided_slice %16 {offsets = [0, 0], sizes = [32, 8], strides = [1, 1]} : vector<32x32xbf16> to vector<32x8xbf16>
    %20 = vector.extract_strided_slice %17 {offsets = [0, 0], sizes = [32, 8], strides = [1, 1]} : vector<32x32xbf16> to vector<32x8xbf16>
    %21 = vector.extract_strided_slice %18 {offsets = [0, 0], sizes = [32, 8], strides = [1, 1]} : vector<32x32xbf16> to vector<32x8xbf16>
    %22 = vector.extract_strided_slice %14 {offsets = [0, 0], sizes = [8, 32], strides = [1, 1]} : vector<32x32xbf16> to vector<8x32xbf16>
    %cst_17 = arith.constant dense<0.000000e+00> : vector<32x32xf32>
    %23 = tpu.matmul %21, %22, %cst_17 {dimension_numbers = #tpu.dot_dimension_numbers<[1], [0], [0], [1], [0, 0, 1, 1], [], []>} : vector<32x8xbf16>, vector<8x32xbf16>, vector<32x32xf32> -> vector<32x32xf32>
    %cst_18 = arith.constant dense<0.000000e+00> : vector<32x32xf32>
    %24 = tpu.matmul %19, %20, %cst_18 {dimension_numbers = #tpu.dot_dimension_numbers<[1], [1], [0], [0], [0, 0, 1, 0], [], []>} : vector<32x8xbf16>, vector<32x8xbf16>, vector<32x32xf32> -> vector<32x32xf32>
    %cst_19 = arith.constant 0.353553385 : f32
    %25 = vector.broadcast %cst_19 : f32 to vector<32x32xf32>
    %26 = arith.mulf %24, %25 : vector<32x32xf32>
    %27 = arith.addf %26, %3 : vector<32x32xf32>
    %cst_20 = arith.constant dense<0xFF800000> : vector<32xf32>
    %28 = vector.multi_reduction <maximumf>, %27, %cst_20 [1] : vector<32x32xf32> to vector<32xf32>
    %29 = vector.shape_cast %28 : vector<32xf32> to vector<32x1xf32>
    %30 = vector.broadcast %29 : vector<32x1xf32> to vector<32x32xf32>
    %31 = arith.subf %27, %30 : vector<32x32xf32>
    %32 = math.exp %31 : vector<32x32xf32>
    %cst_21 = arith.constant dense<0.000000e+00> : vector<32xf32>
    %33 = vector.multi_reduction <add>, %32, %cst_21 [1] : vector<32x32xf32> to vector<32xf32>
    %34 = vector.shape_cast %33 : vector<32xf32> to vector<32x1xf32>
    %35 = tpu.reciprocal %34 {approx = true} : vector<32x1xf32> -> vector<32x1xf32>
    %36 = vector.broadcast %35 : vector<32x1xf32> to vector<32x32xf32>
    %37 = arith.mulf %32, %36 : vector<32x32xf32>
    %38 = arith.truncf %37 : vector<32x32xf32> to vector<32x32xbf16>
    %39 = arith.truncf %23 : vector<32x32xf32> to vector<32x32xbf16>
    %cst_22 = arith.constant dense<0.000000e+00> : vector<32x32xf32>
    %40 = tpu.matmul %38, %39, %cst_22 {dimension_numbers = #tpu.dot_dimension_numbers<[1], [0], [0], [1], [0, 0, 1, 1], [], []>} : vector<32x32xbf16>, vector<32x32xbf16>, vector<32x32xf32> -> vector<32x32xf32>
    %41 = vector.extract_strided_slice %16 {offsets = [0, 8], sizes = [32, 8], strides = [1, 1]} : vector<32x32xbf16> to vector<32x8xbf16>
    %42 = vector.extract_strided_slice %17 {offsets = [0, 8], sizes = [32, 8], strides = [1, 1]} : vector<32x32xbf16> to vector<32x8xbf16>
    %43 = vector.extract_strided_slice %18 {offsets = [0, 8], sizes = [32, 8], strides = [1, 1]} : vector<32x32xbf16> to vector<32x8xbf16>
    %44 = vector.extract_strided_slice %14 {offsets = [8, 0], sizes = [8, 32], strides = [1, 1]} : vector<32x32xbf16> to vector<8x32xbf16>
    %cst_23 = arith.constant dense<0.000000e+00> : vector<32x32xf32>
    %45 = tpu.matmul %43, %44, %cst_23 {dimension_numbers = #tpu.dot_dimension_numbers<[1], [0], [0], [1], [0, 0, 1, 1], [], []>} : vector<32x8xbf16>, vector<8x32xbf16>, vector<32x32xf32> -> vector<32x32xf32>
    %cst_24 = arith.constant dense<0.000000e+00> : vector<32x32xf32>
    %46 = tpu.matmul %41, %42, %cst_24 {dimension_numbers = #tpu.dot_dimension_numbers<[1], [1], [0], [0], [0, 0, 1, 0], [], []>} : vector<32x8xbf16>, vector<32x8xbf16>, vector<32x32xf32> -> vector<32x32xf32>
    %cst_25 = arith.constant 0.353553385 : f32
    %47 = vector.broadcast %cst_25 : f32 to vector<32x32xf32>
    %48 = arith.mulf %46, %47 : vector<32x32xf32>
    %49 = arith.addf %48, %3 : vector<32x32xf32>
    %cst_26 = arith.constant dense<0xFF800000> : vector<32xf32>
    %50 = vector.multi_reduction <maximumf>, %49, %cst_26 [1] : vector<32x32xf32> to vector<32xf32>
    %51 = vector.shape_cast %50 : vector<32xf32> to vector<32x1xf32>
    %52 = vector.broadcast %51 : vector<32x1xf32> to vector<32x32xf32>
    %53 = arith.subf %49, %52 : vector<32x32xf32>
    %54 = math.exp %53 : vector<32x32xf32>
    %cst_27 = arith.constant dense<0.000000e+00> : vector<32xf32>
    %55 = vector.multi_reduction <add>, %54, %cst_27 [1] : vector<32x32xf32> to vector<32xf32>
    %56 = vector.shape_cast %55 : vector<32xf32> to vector<32x1xf32>
    %57 = tpu.reciprocal %56 {approx = true} : vector<32x1xf32> -> vector<32x1xf32>
    %58 = vector.broadcast %57 : vector<32x1xf32> to vector<32x32xf32>
    %59 = arith.mulf %54, %58 : vector<32x32xf32>
    %60 = arith.truncf %59 : vector<32x32xf32> to vector<32x32xbf16>
    %61 = arith.truncf %45 : vector<32x32xf32> to vector<32x32xbf16>
    %cst_28 = arith.constant dense<0.000000e+00> : vector<32x32xf32>
    %62 = tpu.matmul %60, %61, %cst_28 {dimension_numbers = #tpu.dot_dimension_numbers<[1], [0], [0], [1], [0, 0, 1, 1], [], []>} : vector<32x32xbf16>, vector<32x32xbf16>, vector<32x32xf32> -> vector<32x32xf32>
    %63 = arith.addf %40, %62 : vector<32x32xf32>
    %64 = vector.extract_strided_slice %16 {offsets = [0, 16], sizes = [32, 8], strides = [1, 1]} : vector<32x32xbf16> to vector<32x8xbf16>
    %65 = vector.extract_strided_slice %17 {offsets = [0, 16], sizes = [32, 8], strides = [1, 1]} : vector<32x32xbf16> to vector<32x8xbf16>
    %66 = vector.extract_strided_slice %18 {offsets = [0, 16], sizes = [32, 8], strides = [1, 1]} : vector<32x32xbf16> to vector<32x8xbf16>
    %67 = vector.extract_strided_slice %14 {offsets = [16, 0], sizes = [8, 32], strides = [1, 1]} : vector<32x32xbf16> to vector<8x32xbf16>
    %cst_29 = arith.constant dense<0.000000e+00> : vector<32x32xf32>
    %68 = tpu.matmul %66, %67, %cst_29 {dimension_numbers = #tpu.dot_dimension_numbers<[1], [0], [0], [1], [0, 0, 1, 1], [], []>} : vector<32x8xbf16>, vector<8x32xbf16>, vector<32x32xf32> -> vector<32x32xf32>
    %cst_30 = arith.constant dense<0.000000e+00> : vector<32x32xf32>
    %69 = tpu.matmul %64, %65, %cst_30 {dimension_numbers = #tpu.dot_dimension_numbers<[1], [1], [0], [0], [0, 0, 1, 0], [], []>} : vector<32x8xbf16>, vector<32x8xbf16>, vector<32x32xf32> -> vector<32x32xf32>
    %cst_31 = arith.constant 0.353553385 : f32
    %70 = vector.broadcast %cst_31 : f32 to vector<32x32xf32>
    %71 = arith.mulf %69, %70 : vector<32x32xf32>
    %72 = arith.addf %71, %3 : vector<32x32xf32>
    %cst_32 = arith.constant dense<0xFF800000> : vector<32xf32>
    %73 = vector.multi_reduction <maximumf>, %72, %cst_32 [1] : vector<32x32xf32> to vector<32xf32>
    %74 = vector.shape_cast %73 : vector<32xf32> to vector<32x1xf32>
    %75 = vector.broadcast %74 : vector<32x1xf32> to vector<32x32xf32>
    %76 = arith.subf %72, %75 : vector<32x32xf32>
    %77 = math.exp %76 : vector<32x32xf32>
    %cst_33 = arith.constant dense<0.000000e+00> : vector<32xf32>
    %78 = vector.multi_reduction <add>, %77, %cst_33 [1] : vector<32x32xf32> to vector<32xf32>
    %79 = vector.shape_cast %78 : vector<32xf32> to vector<32x1xf32>
    %80 = tpu.reciprocal %79 {approx = true} : vector<32x1xf32> -> vector<32x1xf32>
    %81 = vector.broadcast %80 : vector<32x1xf32> to vector<32x32xf32>
    %82 = arith.mulf %77, %81 : vector<32x32xf32>
    %83 = arith.truncf %82 : vector<32x32xf32> to vector<32x32xbf16>
    %84 = arith.truncf %68 : vector<32x32xf32> to vector<32x32xbf16>
    %cst_34 = arith.constant dense<0.000000e+00> : vector<32x32xf32>
    %85 = tpu.matmul %83, %84, %cst_34 {dimension_numbers = #tpu.dot_dimension_numbers<[1], [0], [0], [1], [0, 0, 1, 1], [], []>} : vector<32x32xbf16>, vector<32x32xbf16>, vector<32x32xf32> -> vector<32x32xf32>
    %86 = arith.addf %63, %85 : vector<32x32xf32>
    %87 = vector.extract_strided_slice %16 {offsets = [0, 24], sizes = [32, 8], strides = [1, 1]} : vector<32x32xbf16> to vector<32x8xbf16>
    %88 = vector.extract_strided_slice %17 {offsets = [0, 24], sizes = [32, 8], strides = [1, 1]} : vector<32x32xbf16> to vector<32x8xbf16>
    %89 = vector.extract_strided_slice %18 {offsets = [0, 24], sizes = [32, 8], strides = [1, 1]} : vector<32x32xbf16> to vector<32x8xbf16>
    %90 = vector.extract_strided_slice %14 {offsets = [24, 0], sizes = [8, 32], strides = [1, 1]} : vector<32x32xbf16> to vector<8x32xbf16>
    %cst_35 = arith.constant dense<0.000000e+00> : vector<32x32xf32>
    %91 = tpu.matmul %89, %90, %cst_35 {dimension_numbers = #tpu.dot_dimension_numbers<[1], [0], [0], [1], [0, 0, 1, 1], [], []>} : vector<32x8xbf16>, vector<8x32xbf16>, vector<32x32xf32> -> vector<32x32xf32>
    %cst_36 = arith.constant dense<0.000000e+00> : vector<32x32xf32>
    %92 = tpu.matmul %87, %88, %cst_36 {dimension_numbers = #tpu.dot_dimension_numbers<[1], [1], [0], [0], [0, 0, 1, 0], [], []>} : vector<32x8xbf16>, vector<32x8xbf16>, vector<32x32xf32> -> vector<32x32xf32>
    %cst_37 = arith.constant 0.353553385 : f32
    %93 = vector.broadcast %cst_37 : f32 to vector<32x32xf32>
    %94 = arith.mulf %92, %93 : vector<32x32xf32>
    %95 = arith.addf %94, %3 : vector<32x32xf32>
    %cst_38 = arith.constant dense<0xFF800000> : vector<32xf32>
    %96 = vector.multi_reduction <maximumf>, %95, %cst_38 [1] : vector<32x32xf32> to vector<32xf32>
    %97 = vector.shape_cast %96 : vector<32xf32> to vector<32x1xf32>
    %98 = vector.broadcast %97 : vector<32x1xf32> to vector<32x32xf32>
    %99 = arith.subf %95, %98 : vector<32x32xf32>
    %100 = math.exp %99 : vector<32x32xf32>
    %cst_39 = arith.constant dense<0.000000e+00> : vector<32xf32>
    %101 = vector.multi_reduction <add>, %100, %cst_39 [1] : vector<32x32xf32> to vector<32xf32>
    %102 = vector.shape_cast %101 : vector<32xf32> to vector<32x1xf32>
    %103 = tpu.reciprocal %102 {approx = true} : vector<32x1xf32> -> vector<32x1xf32>
    %104 = vector.broadcast %103 : vector<32x1xf32> to vector<32x32xf32>
    %105 = arith.mulf %100, %104 : vector<32x32xf32>
    %106 = arith.truncf %105 : vector<32x32xf32> to vector<32x32xbf16>
    %107 = arith.truncf %91 : vector<32x32xf32> to vector<32x32xbf16>
    %cst_40 = arith.constant dense<0.000000e+00> : vector<32x32xf32>
    %108 = tpu.matmul %106, %107, %cst_40 {dimension_numbers = #tpu.dot_dimension_numbers<[1], [0], [0], [1], [0, 0, 1, 1], [], []>} : vector<32x32xbf16>, vector<32x32xbf16>, vector<32x32xf32> -> vector<32x32xf32>
    %109 = arith.addf %86, %108 : vector<32x32xf32>
    %110 = vector.broadcast %15 : vector<1x32xf32> to vector<32x32xf32>
    %111 = arith.addf %109, %110 : vector<32x32xf32>
    %112 = arith.addf %0, %111 : vector<32x32xf32>
    %113 = arith.truncf %112 : vector<32x32xf32> to vector<32x32xbf16>
    %cst_41 = arith.constant dense<0.000000e+00> : vector<32x32xf32>
    %114 = tpu.matmul %2, %113, %cst_41 {dimension_numbers = #tpu.dot_dimension_numbers<[1], [0], [0], [1], [0, 0, 1, 1], [], []>} : vector<32x32xbf16>, vector<32x32xbf16>, vector<32x32xf32> -> vector<32x32xf32>
    %c0_42 = arith.constant 0 : index
    %c0_43 = arith.constant 0 : index
    %115 = vector.load %arg9[%c0_42, %c0_43] : memref<32x32xbf16, #tpu.memory_space<vmem>>, vector<32x32xbf16>
    %116 = arith.truncf %114 : vector<32x32xf32> to vector<32x32xbf16>
    %cst_44 = arith.constant dense<0.000000e+00> : vector<32x32xf32>
    %117 = tpu.matmul %116, %115, %cst_44 {dimension_numbers = #tpu.dot_dimension_numbers<[1], [0], [0], [1], [0, 0, 1, 1], [], []>} : vector<32x32xbf16>, vector<32x32xbf16>, vector<32x32xf32> -> vector<32x32xf32>
    %c0_45 = arith.constant 0 : index
    %c0_46 = arith.constant 0 : index
    %118 = vector.load %arg10[%c0_45, %c0_46] : memref<1x32xf32, #tpu.memory_space<vmem>>, vector<1x32xf32>
    %119 = vector.broadcast %118 : vector<1x32xf32> to vector<32x32xf32>
    %120 = arith.addf %117, %119 : vector<32x32xf32>
    %c0_47 = arith.constant 0 : index
    %c0_48 = arith.constant 0 : index
    %121 = vector.load %arg11[%c0_47, %c0_48] : memref<32x64xbf16, #tpu.memory_space<vmem>>, vector<32x64xbf16>
    %122 = arith.truncf %1 : vector<32x32xf32> to vector<32x32xbf16>
    %cst_49 = arith.constant dense<0.000000e+00> : vector<32x64xf32>
    %123 = tpu.matmul %122, %121, %cst_49 {dimension_numbers = #tpu.dot_dimension_numbers<[1], [0], [0], [1], [0, 0, 1, 1], [], []>} : vector<32x32xbf16>, vector<32x64xbf16>, vector<32x64xf32> -> vector<32x64xf32>
    %c0_50 = arith.constant 0 : index
    %c0_51 = arith.constant 0 : index
    %124 = vector.load %arg12[%c0_50, %c0_51] : memref<1x64xf32, #tpu.memory_space<vmem>>, vector<1x64xf32>
    %125 = vector.broadcast %124 : vector<1x64xf32> to vector<32x64xf32>
    %126 = arith.addf %123, %125 : vector<32x64xf32>
    %127 = vector.extract_strided_slice %126 {offsets = [0, 0], sizes = [32, 32], strides = [1, 1]} : vector<32x64xf32> to vector<32x32xf32>
    %128 = vector.extract_strided_slice %126 {offsets = [0, 32], sizes = [32, 32], strides = [1, 1]} : vector<32x64xf32> to vector<32x32xf32>
    %c0_52 = arith.constant 0 : index
    %c0_53 = arith.constant 0 : index
    %129 = vector.load %arg13[%c0_52, %c0_53] : memref<32x32xbf16, #tpu.memory_space<vmem>>, vector<32x32xbf16>
    %c0_54 = arith.constant 0 : index
    %c0_55 = arith.constant 0 : index
    %130 = vector.load %arg14[%c0_54, %c0_55] : memref<1x32xf32, #tpu.memory_space<vmem>>, vector<1x32xf32>
    %131 = arith.truncf %120 : vector<32x32xf32> to vector<32x32xbf16>
    %132 = arith.truncf %127 : vector<32x32xf32> to vector<32x32xbf16>
    %133 = arith.truncf %128 : vector<32x32xf32> to vector<32x32xbf16>
    %134 = vector.extract_strided_slice %131 {offsets = [0, 0], sizes = [32, 8], strides = [1, 1]} : vector<32x32xbf16> to vector<32x8xbf16>
    %135 = vector.extract_strided_slice %132 {offsets = [0, 0], sizes = [32, 8], strides = [1, 1]} : vector<32x32xbf16> to vector<32x8xbf16>
    %136 = vector.extract_strided_slice %133 {offsets = [0, 0], sizes = [32, 8], strides = [1, 1]} : vector<32x32xbf16> to vector<32x8xbf16>
    %137 = vector.extract_strided_slice %129 {offsets = [0, 0], sizes = [8, 32], strides = [1, 1]} : vector<32x32xbf16> to vector<8x32xbf16>
    %cst_56 = arith.constant dense<0.000000e+00> : vector<32x32xf32>
    %138 = tpu.matmul %136, %137, %cst_56 {dimension_numbers = #tpu.dot_dimension_numbers<[1], [0], [0], [1], [0, 0, 1, 1], [], []>} : vector<32x8xbf16>, vector<8x32xbf16>, vector<32x32xf32> -> vector<32x32xf32>
    %cst_57 = arith.constant dense<0.000000e+00> : vector<32x32xf32>
    %139 = tpu.matmul %134, %135, %cst_57 {dimension_numbers = #tpu.dot_dimension_numbers<[1], [1], [0], [0], [0, 0, 1, 0], [], []>} : vector<32x8xbf16>, vector<32x8xbf16>, vector<32x32xf32> -> vector<32x32xf32>
    %cst_58 = arith.constant 0.353553385 : f32
    %140 = vector.broadcast %cst_58 : f32 to vector<32x32xf32>
    %141 = arith.mulf %139, %140 : vector<32x32xf32>
    %142 = arith.addf %141, %4 : vector<32x32xf32>
    %cst_59 = arith.constant dense<0xFF800000> : vector<32xf32>
    %143 = vector.multi_reduction <maximumf>, %142, %cst_59 [1] : vector<32x32xf32> to vector<32xf32>
    %144 = vector.shape_cast %143 : vector<32xf32> to vector<32x1xf32>
    %145 = vector.broadcast %144 : vector<32x1xf32> to vector<32x32xf32>
    %146 = arith.subf %142, %145 : vector<32x32xf32>
    %147 = math.exp %146 : vector<32x32xf32>
    %cst_60 = arith.constant dense<0.000000e+00> : vector<32xf32>
    %148 = vector.multi_reduction <add>, %147, %cst_60 [1] : vector<32x32xf32> to vector<32xf32>
    %149 = vector.shape_cast %148 : vector<32xf32> to vector<32x1xf32>
    %150 = tpu.reciprocal %149 {approx = true} : vector<32x1xf32> -> vector<32x1xf32>
    %151 = vector.broadcast %150 : vector<32x1xf32> to vector<32x32xf32>
    %152 = arith.mulf %147, %151 : vector<32x32xf32>
    %153 = arith.truncf %152 : vector<32x32xf32> to vector<32x32xbf16>
    %154 = arith.truncf %138 : vector<32x32xf32> to vector<32x32xbf16>
    %cst_61 = arith.constant dense<0.000000e+00> : vector<32x32xf32>
    %155 = tpu.matmul %153, %154, %cst_61 {dimension_numbers = #tpu.dot_dimension_numbers<[1], [0], [0], [1], [0, 0, 1, 1], [], []>} : vector<32x32xbf16>, vector<32x32xbf16>, vector<32x32xf32> -> vector<32x32xf32>
    %156 = vector.extract_strided_slice %131 {offsets = [0, 8], sizes = [32, 8], strides = [1, 1]} : vector<32x32xbf16> to vector<32x8xbf16>
    %157 = vector.extract_strided_slice %132 {offsets = [0, 8], sizes = [32, 8], strides = [1, 1]} : vector<32x32xbf16> to vector<32x8xbf16>
    %158 = vector.extract_strided_slice %133 {offsets = [0, 8], sizes = [32, 8], strides = [1, 1]} : vector<32x32xbf16> to vector<32x8xbf16>
    %159 = vector.extract_strided_slice %129 {offsets = [8, 0], sizes = [8, 32], strides = [1, 1]} : vector<32x32xbf16> to vector<8x32xbf16>
    %cst_62 = arith.constant dense<0.000000e+00> : vector<32x32xf32>
    %160 = tpu.matmul %158, %159, %cst_62 {dimension_numbers = #tpu.dot_dimension_numbers<[1], [0], [0], [1], [0, 0, 1, 1], [], []>} : vector<32x8xbf16>, vector<8x32xbf16>, vector<32x32xf32> -> vector<32x32xf32>
    %cst_63 = arith.constant dense<0.000000e+00> : vector<32x32xf32>
    %161 = tpu.matmul %156, %157, %cst_63 {dimension_numbers = #tpu.dot_dimension_numbers<[1], [1], [0], [0], [0, 0, 1, 0], [], []>} : vector<32x8xbf16>, vector<32x8xbf16>, vector<32x32xf32> -> vector<32x32xf32>
    %cst_64 = arith.constant 0.353553385 : f32
    %162 = vector.broadcast %cst_64 : f32 to vector<32x32xf32>
    %163 = arith.mulf %161, %162 : vector<32x32xf32>
    %164 = arith.addf %163, %4 : vector<32x32xf32>
    %cst_65 = arith.constant dense<0xFF800000> : vector<32xf32>
    %165 = vector.multi_reduction <maximumf>, %164, %cst_65 [1] : vector<32x32xf32> to vector<32xf32>
    %166 = vector.shape_cast %165 : vector<32xf32> to vector<32x1xf32>
    %167 = vector.broadcast %166 : vector<32x1xf32> to vector<32x32xf32>
    %168 = arith.subf %164, %167 : vector<32x32xf32>
    %169 = math.exp %168 : vector<32x32xf32>
    %cst_66 = arith.constant dense<0.000000e+00> : vector<32xf32>
    %170 = vector.multi_reduction <add>, %169, %cst_66 [1] : vector<32x32xf32> to vector<32xf32>
    %171 = vector.shape_cast %170 : vector<32xf32> to vector<32x1xf32>
    %172 = tpu.reciprocal %171 {approx = true} : vector<32x1xf32> -> vector<32x1xf32>
    %173 = vector.broadcast %172 : vector<32x1xf32> to vector<32x32xf32>
    %174 = arith.mulf %169, %173 : vector<32x32xf32>
    %175 = arith.truncf %174 : vector<32x32xf32> to vector<32x32xbf16>
    %176 = arith.truncf %160 : vector<32x32xf32> to vector<32x32xbf16>
    %cst_67 = arith.constant dense<0.000000e+00> : vector<32x32xf32>
    %177 = tpu.matmul %175, %176, %cst_67 {dimension_numbers = #tpu.dot_dimension_numbers<[1], [0], [0], [1], [0, 0, 1, 1], [], []>} : vector<32x32xbf16>, vector<32x32xbf16>, vector<32x32xf32> -> vector<32x32xf32>
    %178 = arith.addf %155, %177 : vector<32x32xf32>
    %179 = vector.extract_strided_slice %131 {offsets = [0, 16], sizes = [32, 8], strides = [1, 1]} : vector<32x32xbf16> to vector<32x8xbf16>
    %180 = vector.extract_strided_slice %132 {offsets = [0, 16], sizes = [32, 8], strides = [1, 1]} : vector<32x32xbf16> to vector<32x8xbf16>
    %181 = vector.extract_strided_slice %133 {offsets = [0, 16], sizes = [32, 8], strides = [1, 1]} : vector<32x32xbf16> to vector<32x8xbf16>
    %182 = vector.extract_strided_slice %129 {offsets = [16, 0], sizes = [8, 32], strides = [1, 1]} : vector<32x32xbf16> to vector<8x32xbf16>
    %cst_68 = arith.constant dense<0.000000e+00> : vector<32x32xf32>
    %183 = tpu.matmul %181, %182, %cst_68 {dimension_numbers = #tpu.dot_dimension_numbers<[1], [0], [0], [1], [0, 0, 1, 1], [], []>} : vector<32x8xbf16>, vector<8x32xbf16>, vector<32x32xf32> -> vector<32x32xf32>
    %cst_69 = arith.constant dense<0.000000e+00> : vector<32x32xf32>
    %184 = tpu.matmul %179, %180, %cst_69 {dimension_numbers = #tpu.dot_dimension_numbers<[1], [1], [0], [0], [0, 0, 1, 0], [], []>} : vector<32x8xbf16>, vector<32x8xbf16>, vector<32x32xf32> -> vector<32x32xf32>
    %cst_70 = arith.constant 0.353553385 : f32
    %185 = vector.broadcast %cst_70 : f32 to vector<32x32xf32>
    %186 = arith.mulf %184, %185 : vector<32x32xf32>
    %187 = arith.addf %186, %4 : vector<32x32xf32>
    %cst_71 = arith.constant dense<0xFF800000> : vector<32xf32>
    %188 = vector.multi_reduction <maximumf>, %187, %cst_71 [1] : vector<32x32xf32> to vector<32xf32>
    %189 = vector.shape_cast %188 : vector<32xf32> to vector<32x1xf32>
    %190 = vector.broadcast %189 : vector<32x1xf32> to vector<32x32xf32>
    %191 = arith.subf %187, %190 : vector<32x32xf32>
    %192 = math.exp %191 : vector<32x32xf32>
    %cst_72 = arith.constant dense<0.000000e+00> : vector<32xf32>
    %193 = vector.multi_reduction <add>, %192, %cst_72 [1] : vector<32x32xf32> to vector<32xf32>
    %194 = vector.shape_cast %193 : vector<32xf32> to vector<32x1xf32>
    %195 = tpu.reciprocal %194 {approx = true} : vector<32x1xf32> -> vector<32x1xf32>
    %196 = vector.broadcast %195 : vector<32x1xf32> to vector<32x32xf32>
    %197 = arith.mulf %192, %196 : vector<32x32xf32>
    %198 = arith.truncf %197 : vector<32x32xf32> to vector<32x32xbf16>
    %199 = arith.truncf %183 : vector<32x32xf32> to vector<32x32xbf16>
    %cst_73 = arith.constant dense<0.000000e+00> : vector<32x32xf32>
    %200 = tpu.matmul %198, %199, %cst_73 {dimension_numbers = #tpu.dot_dimension_numbers<[1], [0], [0], [1], [0, 0, 1, 1], [], []>} : vector<32x32xbf16>, vector<32x32xbf16>, vector<32x32xf32> -> vector<32x32xf32>
    %201 = arith.addf %178, %200 : vector<32x32xf32>
    %202 = vector.extract_strided_slice %131 {offsets = [0, 24], sizes = [32, 8], strides = [1, 1]} : vector<32x32xbf16> to vector<32x8xbf16>
    %203 = vector.extract_strided_slice %132 {offsets = [0, 24], sizes = [32, 8], strides = [1, 1]} : vector<32x32xbf16> to vector<32x8xbf16>
    %204 = vector.extract_strided_slice %133 {offsets = [0, 24], sizes = [32, 8], strides = [1, 1]} : vector<32x32xbf16> to vector<32x8xbf16>
    %205 = vector.extract_strided_slice %129 {offsets = [24, 0], sizes = [8, 32], strides = [1, 1]} : vector<32x32xbf16> to vector<8x32xbf16>
    %cst_74 = arith.constant dense<0.000000e+00> : vector<32x32xf32>
    %206 = tpu.matmul %204, %205, %cst_74 {dimension_numbers = #tpu.dot_dimension_numbers<[1], [0], [0], [1], [0, 0, 1, 1], [], []>} : vector<32x8xbf16>, vector<8x32xbf16>, vector<32x32xf32> -> vector<32x32xf32>
    %cst_75 = arith.constant dense<0.000000e+00> : vector<32x32xf32>
    %207 = tpu.matmul %202, %203, %cst_75 {dimension_numbers = #tpu.dot_dimension_numbers<[1], [1], [0], [0], [0, 0, 1, 0], [], []>} : vector<32x8xbf16>, vector<32x8xbf16>, vector<32x32xf32> -> vector<32x32xf32>
    %cst_76 = arith.constant 0.353553385 : f32
    %208 = vector.broadcast %cst_76 : f32 to vector<32x32xf32>
    %209 = arith.mulf %207, %208 : vector<32x32xf32>
    %210 = arith.addf %209, %4 : vector<32x32xf32>
    %cst_77 = arith.constant dense<0xFF800000> : vector<32xf32>
    %211 = vector.multi_reduction <maximumf>, %210, %cst_77 [1] : vector<32x32xf32> to vector<32xf32>
    %212 = vector.shape_cast %211 : vector<32xf32> to vector<32x1xf32>
    %213 = vector.broadcast %212 : vector<32x1xf32> to vector<32x32xf32>
    %214 = arith.subf %210, %213 : vector<32x32xf32>
    %215 = math.exp %214 : vector<32x32xf32>
    %cst_78 = arith.constant dense<0.000000e+00> : vector<32xf32>
    %216 = vector.multi_reduction <add>, %215, %cst_78 [1] : vector<32x32xf32> to vector<32xf32>
    %217 = vector.shape_cast %216 : vector<32xf32> to vector<32x1xf32>
    %218 = tpu.reciprocal %217 {approx = true} : vector<32x1xf32> -> vector<32x1xf32>
    %219 = vector.broadcast %218 : vector<32x1xf32> to vector<32x32xf32>
    %220 = arith.mulf %215, %219 : vector<32x32xf32>
    %221 = arith.truncf %220 : vector<32x32xf32> to vector<32x32xbf16>
    %222 = arith.truncf %206 : vector<32x32xf32> to vector<32x32xbf16>
    %cst_79 = arith.constant dense<0.000000e+00> : vector<32x32xf32>
    %223 = tpu.matmul %221, %222, %cst_79 {dimension_numbers = #tpu.dot_dimension_numbers<[1], [0], [0], [1], [0, 0, 1, 1], [], []>} : vector<32x32xbf16>, vector<32x32xbf16>, vector<32x32xf32> -> vector<32x32xf32>
    %224 = arith.addf %201, %223 : vector<32x32xf32>
    %225 = vector.broadcast %130 : vector<1x32xf32> to vector<32x32xf32>
    %226 = arith.addf %224, %225 : vector<32x32xf32>
    %227 = arith.addf %114, %226 : vector<32x32xf32>
    %228 = arith.truncf %227 : vector<32x32xf32> to vector<32x32xbf16>
    %cst_80 = arith.constant dense<0.000000e+00> : vector<32x32xf32>
    %229 = tpu.matmul %2, %228, %cst_80 {dimension_numbers = #tpu.dot_dimension_numbers<[1], [0], [0], [1], [0, 0, 1, 1], [], []>} : vector<32x32xbf16>, vector<32x32xbf16>, vector<32x32xf32> -> vector<32x32xf32>
    %c0_81 = arith.constant 0 : index
    %c0_82 = arith.constant 0 : index
    %230 = vector.load %arg15[%c0_81, %c0_82] : memref<32x128xbf16, #tpu.memory_space<vmem>>, vector<32x128xbf16>
    %231 = arith.truncf %229 : vector<32x32xf32> to vector<32x32xbf16>
    %cst_83 = arith.constant dense<0.000000e+00> : vector<32x128xf32>
    %232 = tpu.matmul %231, %230, %cst_83 {dimension_numbers = #tpu.dot_dimension_numbers<[1], [0], [0], [1], [0, 0, 1, 1], [], []>} : vector<32x32xbf16>, vector<32x128xbf16>, vector<32x128xf32> -> vector<32x128xf32>
    %c0_84 = arith.constant 0 : index
    %c0_85 = arith.constant 0 : index
    %233 = vector.load %arg16[%c0_84, %c0_85] : memref<1x128xf32, #tpu.memory_space<vmem>>, vector<1x128xf32>
    %234 = vector.broadcast %233 : vector<1x128xf32> to vector<32x128xf32>
    %235 = arith.addf %232, %234 : vector<32x128xf32>
    %cst_86 = arith.constant 0.000000e+00 : f32
    %236 = vector.broadcast %cst_86 : f32 to vector<32x128xf32>
    %237 = arith.maximumf %235, %236 : vector<32x128xf32>
    %c0_87 = arith.constant 0 : index
    %c0_88 = arith.constant 0 : index
    %238 = vector.load %arg17[%c0_87, %c0_88] : memref<128x32xbf16, #tpu.memory_space<vmem>>, vector<128x32xbf16>
    %239 = arith.truncf %237 : vector<32x128xf32> to vector<32x128xbf16>
    %cst_89 = arith.constant dense<0.000000e+00> : vector<32x32xf32>
    %240 = tpu.matmul %239, %238, %cst_89 {dimension_numbers = #tpu.dot_dimension_numbers<[1], [0], [0], [1], [0, 0, 1, 1], [], []>} : vector<32x128xbf16>, vector<128x32xbf16>, vector<32x32xf32> -> vector<32x32xf32>
    %c0_90 = arith.constant 0 : index
    %c0_91 = arith.constant 0 : index
    %241 = vector.load %arg18[%c0_90, %c0_91] : memref<1x32xf32, #tpu.memory_space<vmem>>, vector<1x32xf32>
    %242 = vector.broadcast %241 : vector<1x32xf32> to vector<32x32xf32>
    %243 = arith.addf %240, %242 : vector<32x32xf32>
    %244 = arith.addf %229, %243 : vector<32x32xf32>
    %245 = arith.truncf %244 : vector<32x32xf32> to vector<32x32xbf16>
    %cst_92 = arith.constant dense<0.000000e+00> : vector<32x32xf32>
    %246 = tpu.matmul %2, %245, %cst_92 {dimension_numbers = #tpu.dot_dimension_numbers<[1], [0], [0], [1], [0, 0, 1, 1], [], []>} : vector<32x32xbf16>, vector<32x32xbf16>, vector<32x32xf32> -> vector<32x32xf32>
    %c0_93 = arith.constant 0 : index
    %c0_94 = arith.constant 0 : index
    %247 = vector.load %arg19[%c0_93, %c0_94] : memref<32x32xf32, #tpu.memory_space<vmem>>, vector<32x32xf32>
    tpu.vector_store %arg19[%c0_93, %c0_94], %246 {strides = array<i32>} : memref<32x32xf32, #tpu.memory_space<vmem>>, vector<32x32xf32>,
    return
  }
}

</mosaic_0001>

<bundles_post_ra>
// kernel: decoder_layer.1
= control target key start
LH: loop header
LB: loop body
LE: loop exit
PB: predicated region body
PF: predicated region fallthrough
CT: control target
= control target key end

     0   :  { %s4144_s0 = inlined_call_operand.vmem [shape: f32[32,32], index: 0, kind: input, shape index: {}]   ;;  %s4145_s1 = inlined_call_operand.vmem [shape: f32[32,32], index: 1, kind: input, shape index: {}]   ;;  %s4146_s2 = inlined_call_operand.vmem [shape: bf16[32,32], index: 2, kind: input, shape index: {}]   ;;  %s4147_s3 = inlined_call_operand.vmem [shape: f32[32,32], index: 3, kind: input, shape index: {}]   ;;  %s4148_s4 = inlined_call_operand.vmem [shape: f32[32,32], index: 4, kind: input, shape index: {}]   ;;  %s4149_s5 = inlined_call_operand.vmem [shape: bf16[32,96], index: 5, kind: input, shape index: {}]   ;;  %s4150_s6 = inlined_call_operand.vmem [shape: f32[1,96], index: 6, kind: input, shape index: {}]   ;;  %s4151_s7 = inlined_call_operand.vmem [shape: bf16[32,32], index: 7, kind: input, shape index: {}]   ;;  %s4152_s8 = inlined_call_operand.vmem [shape: f32[1,32], index: 8, kind: input, shape index: {}]   ;;  %s4153_s9 = inlined_call_operand.vmem [shape: bf16[32,32], index: 9, kind: input, shape index: {}]   ;;  %s4154_s10 = inlined_call_operand.vmem [shape: f32[1,32], index: 10, kind: input, shape index: {}]   ;;  %s4155_s11 = inlined_call_operand.vmem [shape: bf16[32,64], index: 11, kind: input, shape index: {}]   ;;  %s4156_s12 = inlined_call_operand.vmem [shape: f32[1,64], index: 12, kind: input, shape index: {}]   ;;  %s4157_s13 = inlined_call_operand.vmem [shape: bf16[32,32], index: 13, kind: input, shape index: {}]   ;;  %s4158_s14 = inlined_call_operand.vmem [shape: f32[1,32], index: 14, kind: input, shape index: {}]   ;;  %s4159_s15 = inlined_call_operand.vmem [shape: bf16[32,128], index: 15, kind: input, shape index: {}]   ;;  %s4160_s16 = inlined_call_operand.vmem [shape: f32[1,128], index: 16, kind: input, shape index: {}]   ;;  %s4161_s17 = inlined_call_operand.vmem [shape: bf16[128,32], index: 17, kind: input, shape index: {}]   ;;  %s4162_s18 = inlined_call_operand.vmem [shape: f32[1,32], index: 18, kind: input, shape index: {}]   ;;  %s4163_s19 = inlined_call_operand.hbm [shape: f32[32,32], index: 19, kind: output, shape index: {}]  }
   0x1   :  { %4168 = sst [smem:[#allocation5_spill]] %s4144_s0 }
   0x2   :  { %4169 = sst [smem:[#allocation6_spill]] %s4145_s1 }
   0x3   :  { %4170 = sst [smem:[#allocation7_spill]] %s4146_s2 }
   0x4   :  { %4171 = sst [smem:[#allocation8_spill]] %s4147_s3 }
   0x5   :  { %v3243_v0 = vld [vmem:[%s4149_s5] sm:$0xff]   ;;  %v3244_v1 = vld [vmem:[%s4149_s5 + $0x8] sm:$0xff]   ;;  %s4172_s2 = sld [smem:[#allocation5_spill]]  ;;  %vm109_vm0 = vcmask 261120  }
   0x6   :  { %2929 = vmatprep.subr.bf16.mxu0 %v3243_v0 }
   0x7   :  { %2930 = vmatpush3.bf16.msra.mxu0 %v3243_v0 }
   0x8   :  { %2931 = vmatprep.subr.bf16.mxu0 %v3244_v1 }
   0xb   :  { %v3538_v2 = vld [vmem:[%s4172_s2] sm:$0xff]  ;;  %v3543_v3 = vld [vmem:[%s4172_s2 + $0x8] sm:$0xff]  ;;  %v3548_v4 = vld [vmem:[%s4172_s2 + $0x10] sm:$0xff]  ;;  %2932 = vmatpush3.bf16.msra.mxu0 %v3244_v1 }
   0xc   :  { %v88_v5 = vpack.c.bf16 %v3543_v3, %v3538_v2  ;;  %v3555_v6 = vld [vmem:[%s4172_s2 + $0x18] sm:$0xff] }
   0xd   :  { %v89_v7 = vpack.c.bf16 %v3555_v6, %v3548_v4 }
   0xe   :  { %2933 = vmatprep.mubr.msk.bf16.mxu0 %vm109_vm0, %v88_v5 }
   0xf   :  { %2934 = vmatmul.mubr.msk.bf16.vlgmr.msra.gmra.mrb[0].mxu0 %vm109_vm0, %v89_v7 }
  0x10   :  { %24 = vsyncpa [#allocation3], 0  ;;  %v166_v8 = vld [vmem:[%s4151_s7 + $0x4] sm:$0xf]  ;;  %vm185_vm1 = vcmask 1043456   ;;  %s3415_s21 = smov 56  }
  0x11   :  { %3208 = vmatprep.subr.msk.bf16.mxu0 %vm185_vm1, %v166_v8  ;;  %v370_v9 = vsel %vm185_vm1, %v166_v8, 0  ;;  %v165_v10 = vld [vmem:[%s4151_s7] sm:$0xf]  ;;  %s3416_s1 = smov 64   ;;  %s3418_s22 = smov 96   ;;  %vm178_vm2 = vcmask 64512  }
  0x12   :  { %2952 = vmatpush3.bf16.msra.mxu0 %v370_v9  ;;  %3205 = vmatprep.subr.msk.bf16.mxu1 %vm185_vm1, %v165_v10  ;;  %v187_v11 = vsel %vm185_vm1, %v165_v10, 0  ;;  %v2716_v13 = vld [vmem:[%s4150_s6] ss:$0 sm:$0xff]  ;;  %s3417_s6 = smov 88   ;;  %s3419_s2 = smov 120  }
  0x13   :  { %2938 = vmatpush3.bf16.msra.mxu1 %v187_v11  ;;  %s4173_s25 = sld [smem:[#allocation8_spill]]  ;;  %s3420_s0 = smov 80  }
  0x14   :  { %s3421_s30 = smov 48   ;;  %s3423_s23 = smov 72  }
  0x15   :  { %s3424_s24 = smov 112   ;;  %s4174_s27 = sld [smem:[#allocation7_spill]] }
  0x16   :  { %s4175_s5 = sld [smem:[#allocation6_spill]] }
  0x19   :  { %v3615_v50 = vld [vmem:[%s4173_s25 + $0x10] sm:$0xff]  ;;  %v3620_v55 = vld [vmem:[%s4173_s25] sm:$0xff]  ;;  %v3626_v58 = vld [vmem:[%s4173_s25 + $0x8] sm:$0xff] }
  0x1a   :  { %v3634_v8 = vld [vmem:[%s4173_s25 + $0x18] sm:$0xff]  ;;  %s3425_s25 = smov 104  }
  0xe2   :  { %v2935_v12 = vpop.f32.mrb[0].mxu0 }
  0xe3   :  { %v150_v14 = vpop.f32.mrb[1].mxu0  ;;  %v159_v16 = vadd.f32 %v2935_v12, %v2716_v13 }
  0xe4   :  { %v2936_v15 = vpop.f32.mrb[2].mxu0  ;;  %v151_v19 = vadd.f32 %v2716_v13, %v150_v14 }
  0xe5   :  { %v162_v17 = vadd.f32 %v2936_v15, %v2716_v13  ;;  %v153_v18 = vpop.f32.mrb[3].mxu0 }
  0xe6   :  { %v154_v20 = vadd.f32 %v2716_v13, %v153_v18 }
  0xe7   :  { %v3574_v21 = vpack.c.bf16 %v162_v17, %v159_v16 }
  0xe8   :  { %v3576_v22 = vpack.c.bf16 %v154_v20, %v151_v19 }
  0xe9   :  { %361 = vrot.lane.b32.xlu1 %v3574_v21, %s3415_s21 }
  0xea   :  { %359 = vrot.lane.b32.xlu0 %v3576_v22, %s3415_s21 }
  0xed   :  { %174 = vrot.lane.b32.xlu1 %v3576_v22, %s3416_s1 }
  0xee   :  { %425 = vrot.lane.b32.xlu0 %v3576_v22, %s3417_s6 }
  0xf1   :  { %176 = vrot.lane.b32.xlu1 %v3574_v21, %s3416_s1  ;;  %s3422_s1 = smov 40  }
  0xf2   :  { %238 = vrot.lane.b32.xlu0 %v3576_v22, %s3418_s22 }
  0xf5   :  { %240 = vrot.lane.b32.xlu1 %v3574_v21, %s3418_s22 }
  0xf6   :  { %427 = vrot.lane.b32.xlu0 %v3574_v21, %s3417_s6 }
  0xf9   :  { %423 = vrot.lane.b32.xlu1 %v3574_v21, %s3419_s2 }
  0xfa   :  { %421 = vrot.lane.b32.xlu0 %v3576_v22, %s3419_s2 }
 0x15b   :  { %v362_v23 = vpop.permute.xlu1 %361 }
 0x15c   :  { %v360_v24 = vpop.permute.xlu0 %359 }
 0x15d   :  { %2953 = vmatprep.mubr.msk.bf16.mxu0 %vm178_vm2, %v360_v24 }
 0x15e   :  { %2954 = vmatmul.mubr.msk.bf16.vlgmr.msra.gmra.mrb[4].mxu0 %vm178_vm2, %v362_v23 }
 0x15f   :  { %v175_v25 = vpop.permute.xlu1 %174 }
 0x160   :  { %2939 = vmatprep.mubr.msk.bf16.mxu1 %vm178_vm2, %v175_v25  ;;  %v426_v26 = vpop.permute.xlu0 %425 }
 0x161   :  { %3209 = vmatprep.subr.msk.bf16.mxu0 %vm178_vm2, %v426_v26  ;;  %v436_v27 = vsel %vm178_vm2, %v426_v26, 0 }
 0x162   :  { %2958 = vmatpush3.bf16.xpose.msra.mxu0 %v436_v27 }
 0x163   :  { %v177_v28 = vpop.permute.xlu1 %176 }
 0x164   :  { %2940 = vmatmul.mubr.msk.bf16.vlgmr.msra.gmra.mrb[0].mxu1 %vm178_vm2, %v177_v28  ;;  %v239_v29 = vpop.permute.xlu0 %238 }
 0x165   :  { %3206 = vmatprep.subr.msk.bf16.mxu1 %vm178_vm2, %v239_v29  ;;  %2947 = vmatprep.mubr.msk.bf16.mxu1 %vm178_vm2, %v3576_v22  ;;  %v249_v30 = vsel %vm178_vm2, %v239_v29, 0 }
 0x166   :  { %2944 = vmatpush3.bf16.xpose.msra.mxu1 %v249_v30 }
 0x167   :  { %v241_v31 = vpop.permute.xlu1 %240 }
 0x168   :  { %3207 = vmatprep.subr.msk.bf16.mxu1 %vm178_vm2, %v241_v31  ;;  %v428_v32 = vpop.permute.xlu0 %427  ;;  %v252_v35 = vsel %vm178_vm2, %v241_v31, 0 }
 0x169   :  { %3210 = vmatprep.subr.msk.bf16.mxu0 %vm178_vm2, %v428_v32  ;;  %v439_v33 = vsel %vm178_vm2, %v428_v32, 0 }
 0x16a   :  { %2960 = vmatpush3.bf16.xpose.msra.mxu0 %v439_v33 }
 0x16b   :  { %v424_v36 = vpop.permute.xlu1 %423 }
 0x16c   :  { %v422_v34 = vpop.permute.xlu0 %421 }
 0x16d   :  { %2961 = vmatprep.mubr.msk.bf16.mxu0 %vm178_vm2, %v422_v34 }
 0x16e   :  { %2946 = vmatpush3.bf16.xpose.msra.mxu1 %v252_v35 }
 0x171   :  { %2962 = vmatmul.mubr.msk.bf16.vlgmr.msra.gmra.mrb[8].mxu0 %vm178_vm2, %v424_v36 }
 0x175   :  { %2948 = vmatmul.mubr.msk.bf16.vlgmr.msra.gmra.mrb[4].mxu1 %vm178_vm2, %v3574_v21 }
 0x231   :  { %v2955_v37 = vpop.f32.mrb[4].mxu0 }
 0x232   :  { %v406_v38 = vpop.f32.mrb[5].mxu0 }
 0x233   :  { %v2956_v39 = vpop.f32.mrb[6].mxu0 }
 0x234   :  { %v545_v40 = vpack.c.bf16 %v2956_v39, %v2955_v37  ;;  %v409_v41 = vpop.f32.mrb[7].mxu0 }
 0x235   :  { %v544_v42 = vpack.c.bf16 %v409_v41, %v406_v38 }
 0x237   :  { %v2941_v43 = vpop.f32.mrb[0].mxu1  ;;  %2965 = vmatprep.subr.bf16.mxu0 %v544_v42 }
 0x238   :  { %v223_v44 = vpop.f32.mrb[1].mxu1  ;;  %2966 = vmatpush3.bf16.msra.mxu0 %v544_v42 }
 0x239   :  { %v2942_v45 = vpop.f32.mrb[2].mxu1  ;;  %2967 = vmatprep.subr.bf16.mxu0 %v545_v40 }
 0x23a   :  { %v358_v46 = vpack.c.bf16 %v2942_v45, %v2941_v43  ;;  %v226_v47 = vpop.f32.mrb[3].mxu1 }
 0x23b   :  { %v357_v48 = vpack.c.bf16 %v226_v47, %v223_v44 }
 0x23c   :  { %2968 = vmatpush3.bf16.msra.mxu0 %v545_v40 }
 0x23d   :  { %2973 = vmatprep.subr.bf16.mxu1 %v357_v48 }
 0x23e   :  { %2974 = vmatpush3.bf16.msra.mxu1 %v357_v48 }
 0x23f   :  { %2975 = vmatprep.subr.bf16.mxu1 %v358_v46 }
 0x242   :  { %2976 = vmatpush3.bf16.msra.mxu1 %v358_v46 }
 0x244   :  { %v2963_v49 = vpop.f32.mrb[8].mxu0 }
 0x245   :  { %v492_v51 = vmul.f32 0.35355338, %v2963_v49  ;;  %v475_v52 = vpop.f32.mrb[9].mxu0 }
 0x246   :  { %v490_v53 = vmul.f32 0.35355338, %v475_v52  ;;  %v2964_v54 = vpop.f32.mrb[10].mxu0 }
 0x247   :  { %v478_v56 = vpop.f32.mrb[11].mxu0  ;;  %v496_v57 = vadd.f32 %v492_v51, %v3615_v50  ;;  %v493_v61 = vmul.f32 0.35355338, %v2964_v54 }
 0x248   :  { %v491_v59 = vmul.f32 0.35355338, %v478_v56  ;;  %v2949_v60 = vpop.f32.mrb[4].mxu1  ;;  %v494_v0 = vadd.f32 %v490_v53, %v3620_v55 }
 0x249   :  { %v288_v62 = vpop.f32.mrb[5].mxu1  ;;  %v504_v63 = vsel %vm109_vm0, %v496_v57, -inf  ;;  %v305_v10 = vmul.f32 0.35355338, %v2949_v60  ;;  %v497_v15 = vadd.f32 %v493_v61, %v3634_v8 }
 0x24a   :  { %v303_v1 = vmul.f32 0.35355338, %v288_v62  ;;  %v2950_v5 = vpop.f32.mrb[6].mxu1  ;;  %505 = vmax.xlane.f32.xlu0 %v504_v63  ;;  %v495_v7 = vadd.f32 %v491_v59, %v3626_v58  ;;  %v498_v14 = vsel %vm109_vm0, %v494_v0, -inf }
 0x24b   :  { %v291_v9 = vpop.f32.mrb[7].mxu1  ;;  %v309_v17 = vadd.f32 %v305_v10, %v3615_v50  ;;  %v306_v18 = vmul.f32 0.35355338, %v2950_v5  ;;  %v507_v19 = vsel %vm109_vm0, %v497_v15, -inf }
 0x24c   :  { %v501_v11 = vsel %vm109_vm0, %v495_v7, -inf  ;;  %v307_v12 = vadd.f32 %v303_v1, %v3620_v55  ;;  %v304_v13 = vmul.f32 0.35355338, %v291_v9 }
 0x24d   :  { %502 = vmax.xlane.f32.xlu1 %v501_v11  ;;  %v317_v23 = vsel %vm109_vm0, %v309_v17, -inf  ;;  %v310_v25 = vadd.f32 %v306_v18, %v3634_v8  ;;  %v167_v11 = vld [vmem:[%s4151_s7 + $0x8] sm:$0xf] }
 0x24e   :  { %499 = vmax.xlane.f32.xlu0 %v498_v14  ;;  %v311_v16 = vsel %vm109_vm0, %v307_v12, -inf  ;;  %v308_v20 = vadd.f32 %v304_v13, %v3626_v58  ;;  %3211 = vmatprep.subr.msk.bf16.mxu0 %vm185_vm1, %v167_v11 }
 0x24f   :  { %v320_v26 = vsel %vm109_vm0, %v310_v25, -inf }
 0x250   :  { %v314_v24 = vsel %vm109_vm0, %v308_v20, -inf }
 0x251   :  { %312 = vmax.xlane.f32.xlu1 %v311_v16 }
 0x252   :  { %508 = vmax.xlane.f32.xlu0 %v507_v19 }
 0x255   :  { %318 = vmax.xlane.f32.xlu1 %v317_v23 }
 0x256   :  { %315 = vmax.xlane.f32.xlu0 %v314_v24 }
 0x25a   :  { %321 = vmax.xlane.f32.xlu0 %v320_v26 }
 0x2d7   :  { %v506_v27 = vpop.xlane.xlu0 %505 }
 0x2d8   :  { %v512_v28 = vsub.f32 %v496_v57, %v506_v27 }
 0x2da   :  { %v518_v29 = vmul.f32 1.442695, %v512_v28  ;;  %v503_v30 = vpop.xlane.xlu1 %502 }
 0x2db   :  { %v500_v31 = vpop.xlane.xlu0 %499  ;;  %v511_v32 = vsub.f32 %v495_v7, %v503_v30 }
 0x2dc   :  { %3261 = vpow2.f32 %v518_v29  ;;  %v510_v36 = vsub.f32 %v494_v0, %v500_v31 }
 0x2dd   :  { %v516_v37 = vmul.f32 1.442695, %v511_v32 }
 0x2de   :  { %v313_v33 = vpop.xlane.xlu1 %312  ;;  %v514_v43 = vmul.f32 1.442695, %v510_v36 }
 0x2df   :  { %v509_v34 = vpop.xlane.xlu0 %508  ;;  %v323_v44 = vsub.f32 %v307_v12, %v313_v33 }
 0x2e0   :  { %v513_v35 = vsub.f32 %v497_v15, %v509_v34 }
 0x2e1   :  { %v327_v52 = vmul.f32 1.442695, %v323_v44 }
 0x2e2   :  { %v520_v38 = vmul.f32 1.442695, %v513_v35  ;;  %v319_v39 = vpop.xlane.xlu1 %318 }
 0x2e3   :  { %v325_v40 = vsub.f32 %v309_v17, %v319_v39  ;;  %v316_v41 = vpop.xlane.xlu0 %315 }
 0x2e4   :  { %3263 = vpow2.f32 %v520_v38  ;;  %v324_v42 = vsub.f32 %v308_v20, %v316_v41 }
 0x2e5   :  { %v331_v45 = vmul.f32 1.442695, %v325_v40  ;;  %3265 = vpow2.f32 %v516_v37  ;;  %v667_v37 = vsel %vm185_vm1, %v167_v11, 0 }
 0x2e6   :  { %v3648_v46 = vpop.eup %3261  ;;  %v329_v47 = vmul.f32 1.442695, %v324_v42  ;;  %v168_v42 = vld [vmem:[%s4151_s7 + $0xc] sm:$0xf] }
 0x2e7   :  { %3267 = vpow2.f32 %v331_v45  ;;  %v322_v48 = vpop.xlane.xlu0 %321  ;;  %v528_v49 = vsel %vm109_vm0, %v3648_v46, 0.0 }
 0x2e8   :  { %v326_v51 = vsub.f32 %v310_v25, %v322_v48  ;;  %529 = vadd.xlane.f32.xlu1 %v528_v49  ;;  %3269 = vpow2.f32 %v514_v43 }
 0x2e9   :  { %3271 = vpow2.f32 %v329_v47 }
 0x2ea   :  { %v333_v53 = vmul.f32 1.442695, %v326_v51  ;;  %3273 = vpow2.f32 %v327_v52  ;;  %v913_v51 = vsel %vm185_vm1, %v168_v42, 0 }
 0x2ec   :  { %3275 = vpow2.f32 %v333_v53 }
 0x2ee   :  { %v3652_v54 = vpop.eup %3263 }
 0x2ef   :  { %v531_v56 = vsel %vm109_vm0, %v3652_v54, 0.0  ;;  %v3656_v57 = vpop.eup %3265 }
 0x2f0   :  { %532 = vadd.xlane.f32.xlu0 %v531_v56  ;;  %v525_v62 = vsel %vm109_vm0, %v3656_v57, 0.0 }
 0x2f1   :  { %v3658_v59 = vpop.eup %3267 }
 0x2f2   :  { %v341_v60 = vsel %vm109_vm0, %v3658_v59, 0.0  ;;  %v3270_v61 = vpop.eup %3269 }
 0x2f3   :  { %342 = vadd.xlane.f32.xlu1 %v341_v60  ;;  %v3664_v63 = vpop.eup %3271  ;;  %v522_v0 = vsel %vm109_vm0, %v3270_v61, 0.0 }
 0x2f4   :  { %526 = vadd.xlane.f32.xlu0 %v525_v62  ;;  %v3667_v1 = vpop.eup %3273  ;;  %v338_v5 = vsel %vm109_vm0, %v3664_v63, 0.0 }
 0x2f5   :  { %v335_v9 = vsel %vm109_vm0, %v3667_v1, 0.0 }
 0x2f6   :  { %v3671_v7 = vpop.eup %3275 }
 0x2f7   :  { %523 = vadd.xlane.f32.xlu1 %v522_v0  ;;  %v344_v10 = vsel %vm109_vm0, %v3671_v7, 0.0 }
 0x2f8   :  { %339 = vadd.xlane.f32.xlu0 %v338_v5 }
 0x2fb   :  { %336 = vadd.xlane.f32.xlu1 %v335_v9 }
 0x2fc   :  { %345 = vadd.xlane.f32.xlu0 %v344_v10 }
 0x30c   :  { %722 = vrot.lane.b32.xlu1 %v3576_v22, %s3420_s0 }
 0x310   :  { %658 = vrot.lane.b32.xlu1 %v3574_v21, %s3421_s30 }
 0x312   :  { %656 = vrot.lane.b32.xlu0 %v3576_v22, %s3421_s30 }
 0x314   :  { %724 = vrot.lane.b32.xlu1 %v3574_v21, %s3420_s0 }
 0x316   :  { %902 = vrot.lane.b32.xlu0 %v3576_v22, %s3422_s1 }
 0x318   :  { %968 = vrot.lane.b32.xlu1 %v3576_v22, %s3423_s23 }
 0x31a   :  { %904 = vrot.lane.b32.xlu0 %v3574_v21, %s3422_s1 }
 0x31c   :  { %718 = vrot.lane.b32.xlu1 %v3576_v22, %s3424_s24 }
 0x31e   :  { %720 = vrot.lane.b32.xlu0 %v3574_v21, %s3424_s24 }
 0x320   :  { %970 = vrot.lane.b32.xlu1 %v3574_v21, %s3423_s23 }
 0x322   :  { %964 = vrot.lane.b32.xlu0 %v3576_v22, %s3425_s25 }
 0x324   :  { %966 = vrot.lane.b32.xlu1 %v3574_v21, %s3425_s25 }
 0x375   :  { %v530_v12 = vpop.xlane.xlu1 %529 }
 0x37d   :  { %v533_v13 = vpop.xlane.xlu0 %532 }
 0x37e   :  { %3277 = vrcp.f32 %v533_v13 }
 0x380   :  { %v343_v14 = vpop.xlane.xlu1 %342 }
 0x381   :  { %v527_v15 = vpop.xlane.xlu0 %526 }
 0x382   :  { %3279 = vrcp.f32 %v527_v15 }
 0x383   :  { %3281 = vrcp.f32 %v530_v12 }
 0x384   :  { %v524_v16 = vpop.xlane.xlu1 %523 }
 0x385   :  { %3283 = vrcp.f32 %v524_v16  ;;  %v340_v17 = vpop.xlane.xlu0 %339 }
 0x386   :  { %3285 = vrcp.f32 %v340_v17 }
 0x387   :  { %3287 = vrcp.f32 %v343_v14 }
 0x388   :  { %v337_v18 = vpop.xlane.xlu1 %336  ;;  %v3278_v22 = vpop.eup %3277 }
 0x389   :  { %3289 = vrcp.f32 %v337_v18  ;;  %v346_v19 = vpop.xlane.xlu0 %345  ;;  %v541_v26 = vmul.f32 %v3278_v22, %v3652_v54 }
 0x38a   :  { %3291 = vrcp.f32 %v346_v19 }
 0x38c   :  { %v723_v20 = vpop.permute.xlu1 %722  ;;  %v3280_v23 = vpop.eup %3279 }
 0x38d   :  { %v657_v21 = vpop.permute.xlu0 %656  ;;  %3212 = vmatprep.subr.msk.bf16.mxu1 %vm178_vm2, %v723_v20  ;;  %v3282_v24 = vpop.eup %3281  ;;  %v539_v29 = vmul.f32 %v3280_v23, %v3656_v57  ;;  %v733_v48 = vsel %vm178_vm2, %v723_v20, 0 }
 0x38e   :  { %v540_v31 = vmul.f32 %v3282_v24, %v3648_v46 }
 0x38f   :  { %v3284_v25 = vpop.eup %3283 }
 0x390   :  { %v659_v27 = vpop.permute.xlu1 %658  ;;  %v538_v28 = vmul.f32 %v3284_v25, %v3270_v61  ;;  %v3286_v30 = vpop.eup %3285  ;;  %v543_v36 = vpack.c.bf16 %v541_v26, %v540_v31 }
 0x391   :  { %v3288_v32 = vpop.eup %3287  ;;  %v903_v35 = vpop.permute.xlu0 %902  ;;  %v352_v41 = vmul.f32 %v3286_v30, %v3664_v63 }
 0x392   :  { %v542_v33 = vpack.c.bf16 %v539_v29, %v538_v28  ;;  %v353_v43 = vmul.f32 %v3288_v32, %v3658_v59 }
 0x393   :  { %v3290_v34 = vpop.eup %3289 }
 0x394   :  { %v3292_v38 = vpop.eup %3291  ;;  %2969 = vmatprep.mubr.msk.bf16.mxu0 %vm109_vm0, %v542_v33  ;;  %v725_v39 = vpop.permute.xlu1 %724  ;;  %v351_v40 = vmul.f32 %v3290_v34, %v3667_v1 }
 0x395   :  { %v354_v44 = vmul.f32 %v3292_v38, %v3671_v7  ;;  %2970 = vmatmul.mubr.msk.bf16.vlgmr.msra.gmra.mrb[12].mxu0 %vm109_vm0, %v543_v36  ;;  %v905_v49 = vpop.permute.xlu0 %904  ;;  %v736_v54 = vsel %vm178_vm2, %v725_v39, 0 }
 0x396   :  { %2983 = vmatprep.mubr.msk.bf16.mxu0 %vm178_vm2, %v657_v21  ;;  %2982 = vmatpush3.bf16.msra.mxu0 %v667_v37  ;;  %v355_v45 = vpack.c.bf16 %v352_v41, %v351_v40 }
 0x397   :  { %v356_v46 = vpack.c.bf16 %v354_v44, %v353_v43  ;;  %3214 = vmatprep.subr.msk.bf16.mxu0 %vm185_vm1, %v168_v42 }
 0x398   :  { %2977 = vmatprep.mubr.msk.bf16.mxu1 %vm109_vm0, %v355_v45  ;;  %v969_v47 = vpop.permute.xlu1 %968 }
 0x399   :  { %2978 = vmatmul.mubr.msk.bf16.vlgmr.msra.gmra.mrb[8].mxu1 %vm109_vm0, %v356_v46  ;;  %v721_v53 = vpop.permute.xlu0 %720  ;;  %v979_v57 = vsel %vm178_vm2, %v969_v47, 0 }
 0x39a   :  { %2988 = vmatpush3.bf16.xpose.msra.mxu1 %v733_v48 }
 0x39b   :  { %3213 = vmatprep.subr.msk.bf16.mxu1 %vm178_vm2, %v725_v39 }
 0x39c   :  { %v719_v52 = vpop.permute.xlu1 %718 }
 0x39d   :  { %2984 = vmatmul.mubr.msk.bf16.vlgmr.msra.gmra.mrb[16].mxu0 %vm178_vm2, %v659_v27  ;;  %2991 = vmatprep.mubr.msk.bf16.mxu1 %vm178_vm2, %v719_v52  ;;  %v965_v56 = vpop.permute.xlu0 %964 }
 0x39e   :  { %3004 = vmatpush3.bf16.msra.mxu0 %v913_v51  ;;  %3005 = vmatprep.mubr.msk.bf16.mxu0 %vm178_vm2, %v903_v35 }
 0x39f   :  { %3215 = vmatprep.subr.msk.bf16.mxu0 %vm178_vm2, %v969_v47 }
 0x3a0   :  { %v971_v59 = vpop.permute.xlu1 %970 }
 0x3a1   :  { %v982_v60 = vsel %vm178_vm2, %v971_v59, 0 }
 0x3a2   :  { %2990 = vmatpush3.bf16.xpose.msra.mxu1 %v736_v54 }
 0x3a4   :  { %v967_v61 = vpop.permute.xlu1 %966 }
 0x3a5   :  { %3006 = vmatmul.mubr.msk.bf16.vlgmr.msra.gmra.mrb[20].mxu0 %vm178_vm2, %v905_v49 }
 0x3a6   :  { %3013 = vmatprep.mubr.msk.bf16.mxu0 %vm178_vm2, %v965_v56 }
 0x3a7   :  { %3010 = vmatpush3.bf16.xpose.msra.mxu0 %v979_v57 }
 0x3a8   :  { %3216 = vmatprep.subr.msk.bf16.mxu0 %vm178_vm2, %v971_v59 }
 0x3a9   :  { %2992 = vmatmul.mubr.msk.bf16.vlgmr.msra.gmra.mrb[12].mxu1 %vm178_vm2, %v721_v53 }
 0x3af   :  { %3012 = vmatpush3.bf16.xpose.msra.mxu0 %v982_v60 }
 0x3b6   :  { %3014 = vmatmul.mubr.msk.bf16.vlgmr.msra.gmra.mrb[24].mxu0 %vm178_vm2, %v967_v61 }
 0x468   :  { %v3734_v62 = vpop.f32.mrb[12].mxu0 }
 0x469   :  { %v3736_v63 = vpop.f32.mrb[13].mxu0 }
 0x46a   :  { %v3738_v0 = vpop.f32.mrb[14].mxu0 }
 0x46b   :  { %v3740_v1 = vpop.f32.mrb[15].mxu0 }
 0x470   :  { %v2985_v5 = vpop.f32.mrb[16].mxu0 }
 0x471   :  { %v703_v7 = vpop.f32.mrb[17].mxu0 }
 0x472   :  { %v2986_v9 = vpop.f32.mrb[18].mxu0 }
 0x473   :  { %v842_v10 = vpack.c.bf16 %v2986_v9, %v2985_v5  ;;  %v706_v11 = vpop.f32.mrb[19].mxu0 }
 0x474   :  { %v841_v12 = vpack.c.bf16 %v706_v11, %v703_v7 }
 0x476   :  { %2995 = vmatprep.subr.bf16.mxu1 %v841_v12 }
 0x477   :  { %2996 = vmatpush3.bf16.msra.mxu1 %v841_v12 }
 0x478   :  { %2997 = vmatprep.subr.bf16.mxu1 %v842_v10  ;;  %v3007_v13 = vpop.f32.mrb[20].mxu0 }
 0x479   :  { %v949_v14 = vpop.f32.mrb[21].mxu0 }
 0x47a   :  { %v3008_v15 = vpop.f32.mrb[22].mxu0 }
 0x47b   :  { %v3742_v16 = vpack.c.bf16 %v3008_v15, %v3007_v13  ;;  %2998 = vmatpush3.bf16.msra.mxu1 %v842_v10  ;;  %v952_v17 = vpop.f32.mrb[23].mxu0 }
 0x47c   :  { %v2993_v18 = vpop.f32.mrb[12].mxu1  ;;  %v3744_v19 = vpack.c.bf16 %v952_v17, %v949_v14 }
 0x47d   :  { %v772_v22 = vpop.f32.mrb[13].mxu1  ;;  %v789_v20 = vmul.f32 0.35355338, %v2993_v18 }
 0x47e   :  { %v787_v23 = vmul.f32 0.35355338, %v772_v22  ;;  %v2994_v21 = vpop.f32.mrb[14].mxu1  ;;  %3017 = vmatprep.subr.bf16.mxu1 %v3744_v19 }
 0x47f   :  { %v775_v24 = vpop.f32.mrb[15].mxu1  ;;  %v790_v27 = vmul.f32 0.35355338, %v2994_v21  ;;  %v793_v30 = vadd.f32 %v789_v20, %v3615_v50 }
 0x480   :  { %v788_v25 = vmul.f32 0.35355338, %v775_v24  ;;  %v791_v26 = vadd.f32 %v787_v23, %v3620_v55 }
 0x481   :  { %v801_v32 = vsel %vm109_vm0, %v793_v30, -inf  ;;  %v794_v33 = vadd.f32 %v790_v27, %v3634_v8 }
 0x482   :  { %v795_v28 = vsel %vm109_vm0, %v791_v26, -inf  ;;  %v792_v29 = vadd.f32 %v788_v25, %v3626_v58 }
 0x483   :  { %796 = vmax.xlane.f32.xlu0 %v795_v28  ;;  %v804_v36 = vsel %vm109_vm0, %v794_v33, -inf }
 0x484   :  { %v798_v31 = vsel %vm109_vm0, %v792_v29, -inf }
 0x485   :  { %799 = vmax.xlane.f32.xlu1 %v798_v31 }
 0x487   :  { %802 = vmax.xlane.f32.xlu0 %v801_v32 }
 0x489   :  { %v3015_v34 = vpop.f32.mrb[24].mxu0 }
 0x48a   :  { %v1018_v35 = vpop.f32.mrb[25].mxu0  ;;  %v1035_v37 = vmul.f32 0.35355338, %v3015_v34 }
 0x48b   :  { %v1033_v38 = vmul.f32 0.35355338, %v1018_v35  ;;  %805 = vmax.xlane.f32.xlu0 %v804_v36  ;;  %v3016_v39 = vpop.f32.mrb[26].mxu0 }
 0x48c   :  { %v1021_v40 = vpop.f32.mrb[27].mxu0  ;;  %v1036_v41 = vmul.f32 0.35355338, %v3016_v39  ;;  %v1039_v46 = vadd.f32 %v1035_v37, %v3615_v50 }
 0x48d   :  { %v1034_v42 = vmul.f32 0.35355338, %v1021_v40  ;;  %v1037_v43 = vadd.f32 %v1033_v38, %v3620_v55 }
 0x48e   :  { %v1040_v48 = vadd.f32 %v1036_v41, %v3634_v8  ;;  %v1047_v49 = vsel %vm109_vm0, %v1039_v46, -inf }
 0x48f   :  { %v1041_v44 = vsel %vm109_vm0, %v1037_v43, -inf  ;;  %v1038_v45 = vadd.f32 %v1034_v42, %v3626_v58 }
 0x490   :  { %1042 = vmax.xlane.f32.xlu1 %v1041_v44  ;;  %v1050_v51 = vsel %vm109_vm0, %v1040_v48, -inf }
 0x491   :  { %v1044_v47 = vsel %vm109_vm0, %v1038_v45, -inf }
 0x492   :  { %1045 = vmax.xlane.f32.xlu0 %v1044_v47 }
 0x494   :  { %1048 = vmax.xlane.f32.xlu1 %v1047_v49 }
 0x496   :  { %1051 = vmax.xlane.f32.xlu0 %v1050_v51 }
 0x510   :  { %v797_v52 = vpop.xlane.xlu0 %796 }
 0x511   :  { %v807_v55 = vsub.f32 %v791_v26, %v797_v52 }
 0x512   :  { %v800_v53 = vpop.xlane.xlu1 %799 }
 0x513   :  { %v811_v54 = vmul.f32 1.442695, %v807_v55  ;;  %v808_v56 = vsub.f32 %v792_v29, %v800_v53 }
 0x514   :  { %v803_v58 = vpop.xlane.xlu0 %802 }
 0x515   :  { %3293 = vpow2.f32 %v811_v54  ;;  %v813_v50 = vmul.f32 1.442695, %v808_v56  ;;  %v809_v57 = vsub.f32 %v793_v30, %v803_v58 }
 0x517   :  { %3295 = vpow2.f32 %v813_v50  ;;  %v815_v59 = vmul.f32 1.442695, %v809_v57 }
 0x518   :  { %v806_v60 = vpop.xlane.xlu0 %805 }
 0x519   :  { %3297 = vpow2.f32 %v815_v59  ;;  %v810_v8 = vsub.f32 %v794_v33, %v806_v60 }
 0x51b   :  { %v817_v61 = vmul.f32 1.442695, %v810_v8 }
 0x51d   :  { %3299 = vpow2.f32 %v817_v61  ;;  %v1043_v5 = vpop.xlane.xlu1 %1042 }
 0x51e   :  { %v1053_v7 = vsub.f32 %v1037_v43, %v1043_v5 }
 0x51f   :  { %v3294_v9 = vpop.eup %3293  ;;  %v1046_v10 = vpop.xlane.xlu0 %1045 }
 0x520   :  { %v1057_v11 = vmul.f32 1.442695, %v1053_v7  ;;  %v1054_v12 = vsub.f32 %v1038_v45, %v1046_v10  ;;  %v819_v13 = vsel %vm109_vm0, %v3294_v9, 0.0 }
 0x521   :  { %v3296_v14 = vpop.eup %3295  ;;  %820 = vadd.xlane.f32.xlu1 %v819_v13  ;;  %v1049_v15 = vpop.xlane.xlu1 %1048 }
 0x522   :  { %3301 = vpow2.f32 %v1057_v11  ;;  %v1059_v17 = vmul.f32 1.442695, %v1054_v12  ;;  %v1055_v18 = vsub.f32 %v1039_v46, %v1049_v15  ;;  %v822_v22 = vsel %vm109_vm0, %v3296_v14, 0.0 }
 0x523   :  { %v3298_v20 = vpop.eup %3297  ;;  %v1052_v23 = vpop.xlane.xlu0 %1051  ;;  %823 = vadd.xlane.f32.xlu0 %v822_v22 }
 0x524   :  { %3303 = vpow2.f32 %v1059_v17  ;;  %v1061_v21 = vmul.f32 1.442695, %v1055_v18  ;;  %v1056_v24 = vsub.f32 %v1040_v48, %v1052_v23  ;;  %v825_v25 = vsel %vm109_vm0, %v3298_v20, 0.0 }
 0x525   :  { %826 = vadd.xlane.f32.xlu1 %v825_v25 }
 0x526   :  { %3305 = vpow2.f32 %v1061_v21  ;;  %v1063_v26 = vmul.f32 1.442695, %v1056_v24 }
 0x527   :  { %v3300_v27 = vpop.eup %3299 }
 0x528   :  { %3307 = vpow2.f32 %v1063_v26  ;;  %v828_v28 = vsel %vm109_vm0, %v3300_v27, 0.0 }
 0x529   :  { %829 = vadd.xlane.f32.xlu0 %v828_v28  ;;  %v70_v28 = vld [vmem:[%s4175_s5 + $0x10] sm:$0xff] }
 0x52c   :  { %v3302_v29 = vpop.eup %3301 }
 0x52d   :  { %v1065_v30 = vsel %vm109_vm0, %v3302_v29, 0.0 }
 0x52e   :  { %v3304_v31 = vpop.eup %3303  ;;  %1066 = vadd.xlane.f32.xlu1 %v1065_v30 }
 0x52f   :  { %v1068_v32 = vsel %vm109_vm0, %v3304_v31, 0.0 }
 0x530   :  { %v3306_v33 = vpop.eup %3305  ;;  %1069 = vadd.xlane.f32.xlu0 %v1068_v32 }
 0x531   :  { %v1071_v34 = vsel %vm109_vm0, %v3306_v33, 0.0 }
 0x532   :  { %v3308_v35 = vpop.eup %3307  ;;  %1072 = vadd.xlane.f32.xlu1 %v1071_v34 }
 0x533   :  { %v1074_v36 = vsel %vm109_vm0, %v3308_v35, 0.0 }
 0x534   :  { %1075 = vadd.xlane.f32.xlu0 %v1074_v36 }
 0x5ae   :  { %v821_v37 = vpop.xlane.xlu1 %820 }
 0x5af   :  { %3309 = vrcp.f32 %v821_v37 }
 0x5b0   :  { %v824_v38 = vpop.xlane.xlu0 %823 }
 0x5b1   :  { %3311 = vrcp.f32 %v824_v38  ;;  %v2755_v38 = vld [vmem:[%s4156_s12] ss:$0 sm:$0xff] }
 0x5b2   :  { %v827_v39 = vpop.xlane.xlu1 %826 }
 0x5b3   :  { %3313 = vrcp.f32 %v827_v39 }
 0x5b6   :  { %v830_v40 = vpop.xlane.xlu0 %829 }
 0x5b7   :  { %3315 = vrcp.f32 %v830_v40 }
 0x5b9   :  { %v3310_v41 = vpop.eup %3309 }
 0x5ba   :  { %v835_v44 = vmul.f32 %v3310_v41, %v3294_v9  ;;  %v2745_v9 = vld [vmem:[%s4152_s8] ss:$0 sm:$0xff] }
 0x5bb   :  { %v3312_v42 = vpop.eup %3311  ;;  %v1067_v43 = vpop.xlane.xlu1 %1066 }
 0x5bc   :  { %3317 = vrcp.f32 %v1067_v43  ;;  %v836_v45 = vmul.f32 %v3312_v42, %v3296_v14 }
 0x5bd   :  { %v1070_v46 = vpop.xlane.xlu0 %1069  ;;  %v3314_v48 = vpop.eup %3313 }
 0x5be   :  { %3319 = vrcp.f32 %v1070_v46  ;;  %v839_v47 = vpack.c.bf16 %v836_v45, %v835_v44  ;;  %v837_v55 = vmul.f32 %v3314_v48, %v3298_v20 }
 0x5bf   :  { %v1073_v49 = vpop.xlane.xlu1 %1072 }
 0x5c0   :  { %3321 = vrcp.f32 %v1073_v49  ;;  %2999 = vmatprep.mubr.msk.bf16.mxu1 %vm109_vm0, %v839_v47 }
 0x5c1   :  { %v3316_v51 = vpop.eup %3315  ;;  %v1076_v52 = vpop.xlane.xlu0 %1075 }
 0x5c2   :  { %v838_v53 = vmul.f32 %v3316_v51, %v3300_v27  ;;  %3323 = vrcp.f32 %v1076_v52  ;;  %v1389_v52 = vld [vmem:[%s4157_s13] sm:$0xf] }
 0x5c4   :  { %v840_v54 = vpack.c.bf16 %v838_v53, %v837_v55  ;;  %v1390_v55 = vld [vmem:[%s4157_s13 + $0x4] sm:$0xf]  ;;  %v1411_v53 = vsel %vm185_vm1, %v1389_v52, 0 }
 0x5c6   :  { %v3318_v56 = vpop.eup %3317  ;;  %3000 = vmatmul.mubr.msk.bf16.vlgmr.msra.gmra.mrb[8].mxu1 %vm109_vm0, %v840_v54 }
 0x5c7   :  { %3018 = vmatpush3.bf16.msra.mxu1 %v3744_v19  ;;  %v1081_v50 = vmul.f32 %v3318_v56, %v3302_v29  ;;  %v3781_v19 = vld [vmem:[%s4174_s27] sm:$0xff]   ;;  %v71_v29 = vld [vmem:[%s4175_s5 + $0x18] sm:$0xff] }
 0x5c8   :  { %v3320_v58 = vpop.eup %3319  ;;  %3019 = vmatprep.subr.bf16.mxu1 %v3742_v16  ;;  %3029 = vmatprep.mubr.msk.bf16.mxu0 %vm109_vm0, %v3781_v19  ;;  %v1314_v30 = vpack.c.bf16 %v71_v29, %v70_v28 }
 0x5c9   :  { %v1082_v57 = vmul.f32 %v3320_v58, %v3304_v31  ;;  %v3250_v31 = vld [vmem:[%s4153_s9 + $0x8] sm:$0xff]   ;;  %v1590_v58 = vsel %vm185_vm1, %v1390_v55, 0 }
 0x5ca   :  { %v3322_v59 = vpop.eup %3321 }
 0x5cb   :  { %3020 = vmatpush3.bf16.msra.mxu1 %v3742_v16  ;;  %v1085_v60 = vpack.c.bf16 %v1082_v57, %v1081_v50  ;;  %v1083_v61 = vmul.f32 %v3322_v59, %v3306_v33  ;;  %v3249_v16 = vld [vmem:[%s4153_s9] sm:$0xff]  }
 0x5cc   :  { %v3324_v8 = vpop.eup %3323  ;;  %3033 = vmatprep.subr.bf16.mxu1 %v3249_v16 }
 0x5cd   :  { %v1084_v5 = vmul.f32 %v3324_v8, %v3308_v35  ;;  %3021 = vmatprep.mubr.msk.bf16.mxu1 %vm109_vm0, %v1085_v60 }
 0x5cf   :  { %v1086_v7 = vpack.c.bf16 %v1084_v5, %v1083_v61 }
 0x5d2   :  { %3022 = vmatmul.mubr.msk.bf16.vlgmr.msra.gmra.mrb[8].mxu1 %vm109_vm0, %v1086_v7  ;;  %v2750_v7 = vld [vmem:[%s4154_s10] ss:$0 sm:$0xff] }
 0x5d3   :  { %3034 = vmatpush3.bf16.msra.mxu1 %v3249_v16 }
 0x5d4   :  { %3035 = vmatprep.subr.bf16.mxu1 %v3250_v31 }
 0x5d7   :  { %3036 = vmatpush3.bf16.msra.mxu1 %v3250_v31 }
 0x5d8   :  { %3217 = vmatprep.subr.msk.bf16.mxu1 %vm185_vm1, %v1389_v52 }
 0x6a5   :  { %v3023_v10 = vpop.f32.mrb[8].mxu1 }
 0x6a6   :  { %v3181_v11 = vadd.f32 %v3023_v10, %v3734_v62  ;;  %v1129_v12 = vpop.f32.mrb[9].mxu1 }
 0x6a7   :  { %v3182_v13 = vadd.f32 %v1129_v12, %v3736_v63  ;;  %v3024_v14 = vpop.f32.mrb[10].mxu1 }
 0x6a8   :  { %v1156_v15 = vadd.f32 %v3181_v11, %v2745_v9  ;;  %v3183_v17 = vadd.f32 %v3024_v14, %v3738_v0  ;;  %v1132_v18 = vpop.f32.mrb[11].mxu1  ;;  %v3247_v0 = vld [vmem:[%s4155_s11] sm:$0xff]  }
 0x6a9   :  { %v1154_v22 = vadd.f32 %v3182_v13, %v2745_v9  ;;  %v3184_v20 = vadd.f32 %v1132_v18, %v3740_v1  ;;  %v68_v1 = vld [vmem:[%s4175_s5] sm:$0xff] }
 0x6aa   :  { %v1157_v23 = vadd.f32 %v3183_v17, %v2745_v9  ;;  %v1160_v24 = vadd.f32 %v1156_v15, %v3548_v4  ;;  %v69_v4 = vld [vmem:[%s4175_s5 + $0x8] sm:$0xff] }
 0x6ab   :  { %v1155_v21 = vadd.f32 %v3184_v20, %v2745_v9  ;;  %v1158_v26 = vadd.f32 %v1154_v22, %v3538_v2  ;;  %v3811_v2 = vld [vmem:[%s4174_s27 + $0x8] sm:$0xff]  }
 0x6ac   :  { %v1161_v25 = vadd.f32 %v1157_v23, %v3555_v6  ;;  %v3248_v6 = vld [vmem:[%s4155_s11 + $0x8] sm:$0xff]  }
 0x6ad   :  { %v1159_v62 = vadd.f32 %v1155_v21, %v3543_v3  ;;  %v1313_v3 = vpack.c.bf16 %v69_v4, %v68_v1 }
 0x6ae   :  { %v1163_v27 = vpack.c.bf16 %v1161_v25, %v1160_v24 }
 0x6af   :  { %v1162_v63 = vpack.c.bf16 %v1159_v62, %v1158_v26 }
 0x6b1   :  { %3025 = vmatprep.subr.bf16.mxu0 %v1162_v63 }
 0x6b2   :  { %3026 = vmatpush3.bf16.msra.mxu0 %v1162_v63 }
 0x6b3   :  { %3027 = vmatprep.subr.bf16.mxu0 %v1163_v27 }
 0x6b6   :  { %3028 = vmatpush3.bf16.msra.mxu0 %v1163_v27 }
 0x6b7   :  { %3041 = vmatprep.subr.bf16.mxu0 %v3247_v0 }
 0x6b9   :  { %3030 = vmatmul.mubr.msk.bf16.vlgmr.msra.gmra.mrb[28].mxu0 %vm109_vm0, %v3811_v2 }
 0x6ba   :  { %3042 = vmatpush3.bf16.msra.mxu0 %v3247_v0  ;;  %3045 = vmatprep.mubr.msk.bf16.mxu0 %vm109_vm0, %v1313_v3 }
 0x6bb   :  { %3043 = vmatprep.subr.bf16.mxu0 %v3248_v6 }
 0x6be   :  { %3044 = vmatpush3.bf16.msra.mxu0 %v3248_v6 }
 0x6c1   :  { %3046 = vmatmul.mubr.msk.bf16.vlgmr.msra.gmra.mrb[32].mxu0 %vm109_vm0, %v1314_v30 }
 0x78c   :  { %v3829_v32 = vpop.f32.mrb[28].mxu0 }
 0x78d   :  { %v3831_v33 = vpop.f32.mrb[29].mxu0 }
 0x78e   :  { %v3833_v34 = vpop.f32.mrb[30].mxu0 }
 0x78f   :  { %v1234_v35 = vpack.c.bf16 %v3833_v34, %v3829_v32  ;;  %v3837_v36 = vpop.f32.mrb[31].mxu0 }
 0x790   :  { %v1233_v37 = vpack.c.bf16 %v3837_v36, %v3831_v33 }
 0x792   :  { %3037 = vmatprep.mubr.msk.bf16.mxu1 %vm109_vm0, %v1233_v37 }
 0x793   :  { %3038 = vmatmul.mubr.msk.bf16.vlgmr.msra.gmra.mrb[16].mxu1 %vm109_vm0, %v1234_v35 }
 0x794   :  { %v3047_v39 = vpop.f32.mrb[32].mxu0  ;;  %3050 = vmatpush3.bf16.msra.mxu1 %v1411_v53 }
 0x795   :  { %v1383_v40 = vadd.f32 %v3047_v39, %v2755_v38  ;;  %v1374_v41 = vpop.f32.mrb[33].mxu0  ;;  %3220 = vmatprep.subr.msk.bf16.mxu1 %vm185_vm1, %v1390_v55 }
 0x796   :  { %v1375_v42 = vadd.f32 %v2755_v38, %v1374_v41  ;;  %v3048_v43 = vpop.f32.mrb[34].mxu0 }
 0x797   :  { %v1386_v44 = vadd.f32 %v3048_v43, %v2755_v38  ;;  %v1377_v45 = vpop.f32.mrb[35].mxu0 }
 0x798   :  { %v1378_v46 = vadd.f32 %v2755_v38, %v1377_v45  ;;  %v3924_v45 = vld [vmem:[%s4148_s4 + $0x10] sm:$0xff] }
 0x799   :  { %v3846_v47 = vpack.c.bf16 %v1386_v44, %v1383_v40  ;;  %v3913_v40 = vld [vmem:[%s4148_s4] sm:$0xff]  ;;  %v3919_v44 = vld [vmem:[%s4148_s4 + $0x8] sm:$0xff] }
 0x79a   :  { %v3848_v48 = vpack.c.bf16 %v1378_v46, %v1375_v42 }
 0x79b   :  { %1402 = vrot.lane.b32.xlu0 %v3846_v47, %s3418_s22  ;;  %v1472_v51 = vsel %vm178_vm2, %v3846_v47, 0 }
 0x79c   :  { %1400 = vrot.lane.b32.xlu1 %v3848_v48, %s3418_s22  ;;  %3218 = vmatprep.subr.msk.bf16.mxu0 %vm178_vm2, %v3848_v48  ;;  %v1469_v49 = vsel %vm178_vm2, %v3848_v48, 0 }
 0x79d   :  { %3056 = vmatpush3.bf16.xpose.msra.mxu0 %v1469_v49 }
 0x79e   :  { %3219 = vmatprep.subr.msk.bf16.mxu0 %vm178_vm2, %v3846_v47 }
 0x79f   :  { %1581 = vrot.lane.b32.xlu0 %v3846_v47, %s3417_s6 }
 0x7a0   :  { %1579 = vrot.lane.b32.xlu1 %v3848_v48, %s3417_s6 }
 0x7a4   :  { %1647 = vrot.lane.b32.xlu1 %v3848_v48, %s3419_s2 }
 0x7a5   :  { %3058 = vmatpush3.bf16.xpose.msra.mxu0 %v1472_v51 }
 0x7a8   :  { %1649 = vrot.lane.b32.xlu1 %v3846_v47, %s3419_s2 }
 0x80d   :  { %v1403_v54 = vpop.permute.xlu0 %1402 }
 0x80e   :  { %v1401_v56 = vpop.permute.xlu1 %1400 }
 0x80f   :  { %3051 = vmatprep.mubr.msk.bf16.mxu1 %vm178_vm2, %v1401_v56  ;;  %v3934_v56 = vld [vmem:[%s4148_s4 + $0x18] sm:$0xff] }
 0x810   :  { %3052 = vmatmul.mubr.msk.bf16.vlgmr.msra.gmra.mrb[20].mxu1 %vm178_vm2, %v1403_v54 }
 0x811   :  { %3064 = vmatpush3.bf16.msra.mxu1 %v1590_v58  ;;  %v1582_v57 = vpop.permute.xlu0 %1581 }
 0x812   :  { %v1580_v50 = vpop.permute.xlu1 %1579 }
 0x813   :  { %3065 = vmatprep.mubr.msk.bf16.mxu1 %vm178_vm2, %v1580_v50 }
 0x816   :  { %v1648_v59 = vpop.permute.xlu1 %1647 }
 0x817   :  { %v1658_v60 = vsel %vm178_vm2, %v1648_v59, 0  ;;  %3221 = vmatprep.subr.msk.bf16.mxu1 %vm178_vm2, %v1648_v59 }
 0x818   :  { %3066 = vmatmul.mubr.msk.bf16.vlgmr.msra.gmra.mrb[24].mxu1 %vm178_vm2, %v1582_v57 }
 0x81a   :  { %3070 = vmatpush3.bf16.xpose.msra.mxu1 %v1658_v60  ;;  %v1650_v8 = vpop.permute.xlu1 %1649 }
 0x81b   :  { %3222 = vmatprep.subr.msk.bf16.mxu1 %vm178_vm2, %v1650_v8  ;;  %v1661_v61 = vsel %vm178_vm2, %v1650_v8, 0 }
 0x822   :  { %3072 = vmatpush3.bf16.xpose.msra.mxu1 %v1661_v61 }
 0x866   :  { %v3039_v5 = vpop.f32.mrb[16].mxu1 }
 0x867   :  { %v1294_v16 = vpop.f32.mrb[17].mxu1  ;;  %v1303_v10 = vadd.f32 %v3039_v5, %v2750_v7 }
 0x868   :  { %v3040_v9 = vpop.f32.mrb[18].mxu1  ;;  %v1295_v13 = vadd.f32 %v2750_v7, %v1294_v16 }
 0x869   :  { %v1306_v11 = vadd.f32 %v3040_v9, %v2750_v7  ;;  %v1297_v12 = vpop.f32.mrb[19].mxu1 }
 0x86a   :  { %v1298_v14 = vadd.f32 %v2750_v7, %v1297_v12 }
 0x86b   :  { %v3891_v15 = vpack.c.bf16 %v1306_v11, %v1303_v10 }
 0x86c   :  { %v3893_v17 = vpack.c.bf16 %v1298_v14, %v1295_v13 }
 0x86d   :  { %1645 = vrot.lane.b32.xlu1 %v3891_v15, %s3419_s2 }
 0x86e   :  { %1643 = vrot.lane.b32.xlu0 %v3893_v17, %s3419_s2  ;;  %3059 = vmatprep.mubr.msk.bf16.mxu0 %vm178_vm2, %v3893_v17 }
 0x86f   :  { %3060 = vmatmul.mubr.msk.bf16.vlgmr.msra.gmra.mrb[36].mxu0 %vm178_vm2, %v3891_v15 }
 0x8df   :  { %v1646_v22 = vpop.permute.xlu1 %1645 }
 0x8e0   :  { %v1644_v18 = vpop.permute.xlu0 %1643 }
 0x8e1   :  { %3073 = vmatprep.mubr.msk.bf16.mxu1 %vm178_vm2, %v1644_v18 }
 0x8e2   :  { %3074 = vmatmul.mubr.msk.bf16.vlgmr.msra.gmra.mrb[28].mxu1 %vm178_vm2, %v1646_v22 }
 0x8e3   :  { %v3053_v20 = vpop.f32.mrb[20].mxu1 }
 0x8e4   :  { %v1447_v23 = vpop.f32.mrb[21].mxu1 }
 0x8e5   :  { %v3054_v21 = vpop.f32.mrb[22].mxu1 }
 0x8e6   :  { %v3905_v24 = vpack.c.bf16 %v3054_v21, %v3053_v20  ;;  %v1450_v25 = vpop.f32.mrb[23].mxu1 }
 0x8e7   :  { %v3907_v26 = vpack.c.bf16 %v1450_v25, %v1447_v23 }
 0x8eb   :  { %v3067_v62 = vpop.f32.mrb[24].mxu1 }
 0x8ec   :  { %v1626_v27 = vpop.f32.mrb[25].mxu1 }
 0x8ed   :  { %v3068_v63 = vpop.f32.mrb[26].mxu1 }
 0x8ee   :  { %v1767_v0 = vpack.c.bf16 %v3068_v63, %v3067_v62  ;;  %v1629_v1 = vpop.f32.mrb[27].mxu1 }
 0x8ef   :  { %v1766_v4 = vpack.c.bf16 %v1629_v1, %v1626_v27 }
 0x8f1   :  { %3077 = vmatprep.subr.bf16.mxu0 %v1766_v4 }
 0x8f2   :  { %3078 = vmatpush3.bf16.msra.mxu0 %v1766_v4 }
 0x8f3   :  { %3079 = vmatprep.subr.bf16.mxu0 %v1767_v0 }
 0x8f6   :  { %3080 = vmatpush3.bf16.msra.mxu0 %v1767_v0 }
 0x8f7   :  { %3085 = vmatprep.subr.bf16.mxu0 %v3907_v26 }
 0x942   :  { %v3061_v3 = vpop.f32.mrb[36].mxu0 }
 0x943   :  { %v1508_v6 = vpop.f32.mrb[37].mxu0  ;;  %v1525_v55 = vmul.f32 0.35355338, %v3061_v3 }
 0x944   :  { %v3062_v28 = vpop.f32.mrb[38].mxu0  ;;  %v1523_v41 = vmul.f32 0.35355338, %v1508_v6 }
 0x945   :  { %v1511_v29 = vpop.f32.mrb[39].mxu0  ;;  %v1529_v60 = vadd.f32 %v1525_v55, %v3924_v45  ;;  %v1526_v8 = vmul.f32 0.35355338, %v3062_v28 }
 0x946   :  { %v1527_v54 = vadd.f32 %v1523_v41, %v3913_v40  ;;  %v1524_v58 = vmul.f32 0.35355338, %v1511_v29 }
 0x947   :  { %v1537_v7 = vsel %vm109_vm0, %v1529_v60, -inf  ;;  %v1530_v9 = vadd.f32 %v1526_v8, %v3934_v56 }
 0x948   :  { %v1531_v59 = vsel %vm109_vm0, %v1527_v54, -inf  ;;  %v1528_v5 = vadd.f32 %v1524_v58, %v3919_v44 }
 0x949   :  { %v1540_v10 = vsel %vm109_vm0, %v1530_v9, -inf }
 0x94a   :  { %v1534_v16 = vsel %vm109_vm0, %v1528_v5, -inf }
 0x9b5   :  { %v3075_v30 = vpop.f32.mrb[28].mxu1 }
 0x9b6   :  { %v1697_v31 = vpop.f32.mrb[29].mxu1  ;;  %v1714_v35 = vmul.f32 0.35355338, %v3075_v30 }
 0x9b7   :  { %v1712_v37 = vmul.f32 0.35355338, %v1697_v31  ;;  %v3076_v38 = vpop.f32.mrb[30].mxu1 }
 0x9b8   :  { %v1700_v39 = vpop.f32.mrb[31].mxu1  ;;  %v1715_v46 = vmul.f32 0.35355338, %v3076_v38  ;;  %v1718_v52 = vadd.f32 %v1714_v35, %v3924_v45 }
 0x9b9   :  { %v1713_v42 = vmul.f32 0.35355338, %v1700_v39  ;;  %v1716_v43 = vadd.f32 %v1712_v37, %v3913_v40 }
 0x9ba   :  { %v1726_v50 = vsel %vm109_vm0, %v1718_v52, -inf  ;;  %v1719_v57 = vadd.f32 %v1715_v46, %v3934_v56 }
 0x9bb   :  { %v1720_v49 = vsel %vm109_vm0, %v1716_v43, -inf  ;;  %v1717_v51 = vadd.f32 %v1713_v42, %v3919_v44 }
 0x9bc   :  { %1721 = vmax.xlane.f32.xlu0 %v1720_v49  ;;  %v1729_v61 = vsel %vm109_vm0, %v1719_v57, -inf }
 0x9bd   :  { %v1723_v53 = vsel %vm109_vm0, %v1717_v51, -inf }
 0x9be   :  { %1724 = vmax.xlane.f32.xlu1 %v1723_v53 }
 0x9c0   :  { %1727 = vmax.xlane.f32.xlu0 %v1726_v50 }
 0x9c2   :  { %1532 = vmax.xlane.f32.xlu1 %v1531_v59 }
 0x9c4   :  { %1730 = vmax.xlane.f32.xlu0 %v1729_v61  ;;  %v1392_v61 = vld [vmem:[%s4157_s13 + $0xc] sm:$0xf] }
 0x9c6   :  { %1538 = vmax.xlane.f32.xlu1 %v1537_v7 }
 0x9c8   :  { %1535 = vmax.xlane.f32.xlu0 %v1534_v16 }
 0x9cc   :  { %1541 = vmax.xlane.f32.xlu0 %v1540_v10 }
 0xa49   :  { %v1722_v11 = vpop.xlane.xlu0 %1721 }
 0xa4a   :  { %v1732_v13 = vsub.f32 %v1716_v43, %v1722_v11 }
 0xa4b   :  { %v1725_v12 = vpop.xlane.xlu1 %1724 }
 0xa4c   :  { %v1733_v14 = vsub.f32 %v1717_v51, %v1725_v12  ;;  %v1736_v21 = vmul.f32 1.442695, %v1732_v13 }
 0xa4d   :  { %v1728_v18 = vpop.xlane.xlu0 %1727 }
 0xa4e   :  { %v1738_v22 = vmul.f32 1.442695, %v1733_v14  ;;  %v1734_v20 = vsub.f32 %v1718_v52, %v1728_v18 }
 0xa4f   :  { %v1533_v23 = vpop.xlane.xlu1 %1532 }
 0xa50   :  { %3325 = vpow2.f32 %v1738_v22  ;;  %v1740_v25 = vmul.f32 1.442695, %v1734_v20  ;;  %v1543_v62 = vsub.f32 %v1527_v54, %v1533_v23 }
 0xa51   :  { %v1731_v27 = vpop.xlane.xlu0 %1730 }
 0xa52   :  { %3327 = vpow2.f32 %v1740_v25  ;;  %v1735_v63 = vsub.f32 %v1719_v57, %v1731_v27  ;;  %v1547_v1 = vmul.f32 1.442695, %v1543_v62 }
 0xa53   :  { %v1539_v0 = vpop.xlane.xlu1 %1538  ;;  %3329 = vpow2.f32 %v1736_v21 }
 0xa54   :  { %v1742_v4 = vmul.f32 1.442695, %v1735_v63  ;;  %v1545_v3 = vsub.f32 %v1529_v60, %v1539_v0  ;;  %v1391_v60 = vld [vmem:[%s4157_s13 + $0x8] sm:$0xf]  ;;  %v2135_v63 = vsel %vm185_vm1, %v1392_v61, 0 }
 0xa55   :  { %v1536_v6 = vpop.xlane.xlu0 %1535  ;;  %3223 = vmatprep.subr.msk.bf16.mxu1 %vm185_vm1, %v1391_v60  ;;  %v1889_v8 = vsel %vm185_vm1, %v1391_v60, 0 }
 0xa56   :  { %3331 = vpow2.f32 %v1742_v4  ;;  %v1544_v28 = vsub.f32 %v1528_v5, %v1536_v6  ;;  %v1551_v29 = vmul.f32 1.442695, %v1545_v3  ;;  %3094 = vmatpush3.bf16.msra.mxu1 %v1889_v8 }
 0xa57   :  { %3333 = vpow2.f32 %v1547_v1  ;;  %3226 = vmatprep.subr.msk.bf16.mxu1 %vm185_vm1, %v1392_v61 }
 0xa58   :  { %v1549_v30 = vmul.f32 1.442695, %v1544_v28 }
 0xa59   :  { %v1542_v31 = vpop.xlane.xlu0 %1541 }
 0xa5a   :  { %v3946_v35 = vpop.eup %3325  ;;  %3335 = vpow2.f32 %v1549_v30  ;;  %v1546_v37 = vsub.f32 %v1530_v9, %v1542_v31 }
 0xa5b   :  { %v1747_v38 = vsel %vm109_vm0, %v3946_v35, 0.0  ;;  %3337 = vpow2.f32 %v1551_v29 }
 0xa5c   :  { %v3950_v39 = vpop.eup %3327  ;;  %v1553_v41 = vmul.f32 1.442695, %v1546_v37  ;;  %1748 = vadd.xlane.f32.xlu0 %v1747_v38 }
 0xa5d   :  { %v1750_v42 = vsel %vm109_vm0, %v3950_v39, 0.0  ;;  %v3330_v43 = vpop.eup %3329 }
 0xa5e   :  { %3339 = vpow2.f32 %v1553_v41  ;;  %1751 = vadd.xlane.f32.xlu1 %v1750_v42  ;;  %v1744_v49 = vsel %vm109_vm0, %v3330_v43, 0.0 }
 0xa60   :  { %v3332_v46 = vpop.eup %3331 }
 0xa61   :  { %v1753_v51 = vsel %vm109_vm0, %v3332_v46, 0.0  ;;  %v3956_v52 = vpop.eup %3333 }
 0xa62   :  { %1745 = vadd.xlane.f32.xlu1 %v1744_v49  ;;  %1754 = vadd.xlane.f32.xlu0 %v1753_v51  ;;  %v1555_v53 = vsel %vm109_vm0, %v3956_v52, 0.0 }
 0xa64   :  { %v3958_v55 = vpop.eup %3335 }
 0xa65   :  { %v1558_v54 = vsel %vm109_vm0, %v3958_v55, 0.0  ;;  %v3964_v58 = vpop.eup %3337 }
 0xa66   :  { %1556 = vadd.xlane.f32.xlu1 %v1555_v53  ;;  %1559 = vadd.xlane.f32.xlu0 %v1558_v54  ;;  %v1561_v57 = vsel %vm109_vm0, %v3964_v58, 0.0 }
 0xa68   :  { %v3966_v50 = vpop.eup %3339 }
 0xa69   :  { %v1564_v59 = vsel %vm109_vm0, %v3966_v50, 0.0 }
 0xa6a   :  { %1562 = vadd.xlane.f32.xlu1 %v1561_v57  ;;  %1565 = vadd.xlane.f32.xlu0 %v1564_v59 }
 0xa7b   :  { %1944 = vrot.lane.b32.xlu1 %v3848_v48, %s3424_s24 }
 0xa7f   :  { %1880 = vrot.lane.b32.xlu1 %v3846_v47, %s3420_s0 }
 0xa80   :  { %1878 = vrot.lane.b32.xlu0 %v3848_v48, %s3420_s0  ;;  %s3426_s0 = smov [#allocation2]  }
 0xa83   :  { %1946 = vrot.lane.b32.xlu1 %v3846_v47, %s3424_s24 }
 0xa84   :  { %2124 = vrot.lane.b32.xlu0 %v3848_v48, %s3423_s23 }
 0xa87   :  { %2190 = vrot.lane.b32.xlu1 %v3848_v48, %s3425_s25 }
 0xa88   :  { %2126 = vrot.lane.b32.xlu0 %v3846_v47, %s3423_s23  ;;  %s2705_s23 = sshll.u32 %s3426_s0, 4  ;;  %s2706_s23 = int_to_ptr.vmem [resolvable:$true] %s2705_s23 }
 0xa89   :  { %p3396_p1 = scmp.lt.s32.totalorder %s2706_s23, %s2706_s23 }
 0xa8b   :  { %1940 = vrot.lane.b32.xlu1 %v3893_v17, %s3424_s24 }
 0xa8c   :  { %1942 = vrot.lane.b32.xlu0 %v3891_v15, %s3424_s24  ;;  %s3391_s24 = scalar_lea.vmem %s2706_s23, 512 }
 0xa8d   :  { %p3392_p0 = scmp.ne.s32.totalorder %s2706_s23, %s3391_s24  ;;  %p3397_p2 = scmp.lt.s32.totalorder %s3391_s24, %s3391_s24 }
 0xa8f   :  { %2192 = vrot.lane.b32.xlu1 %v3846_v47, %s3425_s25  ;;  %p3398_p3 = por %p3397_p2, %p3396_p1 }
 0xa90   :  { %2186 = vrot.lane.b32.xlu0 %v3893_v17, %s3425_s25 }
 0xa91   :  { %p3399_p4 = pnand %p3398_p3, %p3392_p0 }
 0xa93   :  { %2188 = vrot.lane.b32.xlu1 %v3891_v15, %s3425_s25 }
 0xae9   :  { %v1749_v5 = vpop.xlane.xlu0 %1748 }
 0xaea   :  { %3341 = vrcp.f32 %v1749_v5 }
 0xaeb   :  { %v1752_v48 = vpop.xlane.xlu1 %1751 }
 0xaec   :  { %3343 = vrcp.f32 %v1752_v48 }
 0xaef   :  { %v1746_v7 = vpop.xlane.xlu1 %1745  ;;  %v1755_v16 = vpop.xlane.xlu0 %1754 }
 0xaf0   :  { %3345 = vrcp.f32 %v1746_v7 }
 0xaf1   :  { %3347 = vrcp.f32 %v1755_v16 }
 0xaf3   :  { %v1557_v9 = vpop.xlane.xlu1 %1556  ;;  %v1560_v10 = vpop.xlane.xlu0 %1559 }
 0xaf4   :  { %3349 = vrcp.f32 %v1557_v9  ;;  %v3342_v12 = vpop.eup %3341 }
 0xaf5   :  { %3351 = vrcp.f32 %v1560_v10  ;;  %v1761_v20 = vmul.f32 %v3342_v12, %v3946_v35 }
 0xaf6   :  { %v3344_v17 = vpop.eup %3343 }
 0xaf7   :  { %v1563_v11 = vpop.xlane.xlu1 %1562  ;;  %v1566_v47 = vpop.xlane.xlu0 %1565  ;;  %v1762_v23 = vmul.f32 %v3344_v17, %v3950_v39 }
 0xaf8   :  { %3353 = vrcp.f32 %v1563_v11 }
 0xaf9   :  { %3355 = vrcp.f32 %v1566_v47 }
 0xafa   :  { %v3346_v13 = vpop.eup %3345 }
 0xafb   :  { %v3348_v15 = vpop.eup %3347  ;;  %v1945_v14 = vpop.permute.xlu1 %1944  ;;  %v1760_v22 = vmul.f32 %v3346_v13, %v3330_v43 }
 0xafc   :  { %v1879_v18 = vpop.permute.xlu0 %1878  ;;  %v1763_v21 = vmul.f32 %v3348_v15, %v3332_v46 }
 0xafd   :  { %3095 = vmatprep.mubr.msk.bf16.mxu1 %vm178_vm2, %v1879_v18  ;;  %v1764_v25 = vpack.c.bf16 %v1761_v20, %v1760_v22 }
 0xafe   :  { %v3350_v62 = vpop.eup %3349  ;;  %v1765_v27 = vpack.c.bf16 %v1763_v21, %v1762_v23 }
 0xaff   :  { %v3352_v0 = vpop.eup %3351  ;;  %v1881_v1 = vpop.permute.xlu1 %1880  ;;  %3081 = vmatprep.mubr.msk.bf16.mxu0 %vm109_vm0, %v1764_v25  ;;  %v1571_v3 = vmul.f32 %v3350_v62, %v3956_v52 }
 0xb00   :  { %v2125_v4 = vpop.permute.xlu0 %2124  ;;  %3082 = vmatmul.mubr.msk.bf16.vlgmr.msra.gmra.mrb[40].mxu0 %vm109_vm0, %v1765_v27  ;;  %3096 = vmatmul.mubr.msk.bf16.vlgmr.msra.gmra.mrb[32].mxu1 %vm178_vm2, %v1881_v1  ;;  %v1572_v6 = vmul.f32 %v3352_v0, %v3958_v55 }
 0xb01   :  { %3086 = vmatpush3.bf16.msra.mxu0 %v3907_v26  ;;  %3116 = vmatpush3.bf16.msra.mxu1 %v2135_v63 }
 0xb02   :  { %v3354_v28 = vpop.eup %3353  ;;  %3087 = vmatprep.subr.bf16.mxu0 %v3905_v24  ;;  %3117 = vmatprep.mubr.msk.bf16.mxu1 %vm178_vm2, %v2125_v4  ;;  %v1575_v29 = vpack.c.bf16 %v1572_v6, %v1571_v3 }
 0xb03   :  { %v3356_v30 = vpop.eup %3355  ;;  %v1947_v31 = vpop.permute.xlu1 %1946  ;;  %v1573_v37 = vmul.f32 %v3354_v28, %v3964_v58 }
 0xb04   :  { %v2127_v35 = vpop.permute.xlu0 %2126  ;;  %3089 = vmatprep.mubr.msk.bf16.mxu0 %vm109_vm0, %v1575_v29  ;;  %v1574_v38 = vmul.f32 %v3356_v30, %v3966_v50  ;;  %v1958_v52 = vsel %vm178_vm2, %v1947_v31, 0 }
 0xb05   :  { %3088 = vmatpush3.bf16.msra.mxu0 %v3905_v24  ;;  %v1955_v24 = vsel %vm178_vm2, %v1945_v14, 0 }
 0xb06   :  { %3224 = vmatprep.subr.msk.bf16.mxu0 %vm178_vm2, %v1945_v14  ;;  %v1576_v42 = vpack.c.bf16 %v1574_v38, %v1573_v37 }
 0xb07   :  { %v2191_v26 = vpop.permute.xlu1 %2190 }
 0xb08   :  { %v1943_v39 = vpop.permute.xlu0 %1942  ;;  %v2201_v41 = vsel %vm178_vm2, %v2191_v26, 0  ;;  %3118 = vmatmul.mubr.msk.bf16.vlgmr.msra.gmra.mrb[36].mxu1 %vm178_vm2, %v2127_v35  ;;  %3227 = vmatprep.subr.msk.bf16.mxu1 %vm178_vm2, %v2191_v26 }
 0xb0a   :  { %3122 = vmatpush3.bf16.xpose.msra.mxu1 %v2201_v41 }
 0xb0b   :  { %v1941_v43 = vpop.permute.xlu1 %1940 }
 0xb0c   :  { %v2187_v46 = vpop.permute.xlu0 %2186  ;;  %3090 = vmatmul.mubr.msk.bf16.vlgmr.msra.gmra.mrb[40].mxu0 %vm109_vm0, %v1576_v42 }
 0xb0d   :  { %3125 = vmatprep.mubr.msk.bf16.mxu1 %vm178_vm2, %v2187_v46  ;;  %3103 = vmatprep.mubr.msk.bf16.mxu0 %vm178_vm2, %v1941_v43 }
 0xb0e   :  { %3100 = vmatpush3.bf16.xpose.msra.mxu0 %v1955_v24 }
 0xb0f   :  { %3225 = vmatprep.subr.msk.bf16.mxu0 %vm178_vm2, %v1947_v31  ;;  %v2193_v49 = vpop.permute.xlu1 %2192 }
 0xb10   :  { %v2204_v51 = vsel %vm178_vm2, %v2193_v49, 0  ;;  %3228 = vmatprep.subr.msk.bf16.mxu1 %vm178_vm2, %v2193_v49 }
 0xb12   :  { %3124 = vmatpush3.bf16.xpose.msra.mxu1 %v2204_v51 }
 0xb13   :  { %v2189_v55 = vpop.permute.xlu1 %2188 }
 0xb16   :  { %3102 = vmatpush3.bf16.xpose.msra.mxu0 %v1958_v52 }
 0xb19   :  { %3126 = vmatmul.mubr.msk.bf16.vlgmr.msra.gmra.mrb[40].mxu1 %vm178_vm2, %v2189_v55 }
 0xb1a   :  { %3141 = vmatprep.mubr.msk.bf16.mxu1 %vm109_vm0, %v3781_v19 }
 0xb1d   :  { %3104 = vmatmul.mubr.msk.bf16.vlgmr.msra.gmra.mrb[44].mxu0 %vm178_vm2, %v1943_v39 }
 0xbd3   :  { %v3097_v53 = vpop.f32.mrb[32].mxu1 }
 0xbd4   :  { %v1925_v54 = vpop.f32.mrb[33].mxu1 }
 0xbd5   :  { %v3098_v58 = vpop.f32.mrb[34].mxu1 }
 0xbd6   :  { %v2064_v50 = vpack.c.bf16 %v3098_v58, %v3097_v53  ;;  %v1928_v57 = vpop.f32.mrb[35].mxu1 }
 0xbd7   :  { %v2063_v59 = vpack.c.bf16 %v1928_v57, %v1925_v54 }
 0xbd9   :  { %3107 = vmatprep.subr.bf16.mxu0 %v2063_v59 }
 0xbda   :  { %3108 = vmatpush3.bf16.msra.mxu0 %v2063_v59 }
 0xbdb   :  { %3109 = vmatprep.subr.bf16.mxu0 %v2064_v50  ;;  %v3119_v60 = vpop.f32.mrb[36].mxu1 }
 0xbdc   :  { %v2171_v8 = vpop.f32.mrb[37].mxu1 }
 0xbdd   :  { %v3120_v61 = vpop.f32.mrb[38].mxu1 }
 0xbde   :  { %v4037_v5 = vpack.c.bf16 %v3120_v61, %v3119_v60  ;;  %3110 = vmatpush3.bf16.msra.mxu0 %v2064_v50  ;;  %v2174_v48 = vpop.f32.mrb[39].mxu1 }
 0xbdf   :  { %v4039_v7 = vpack.c.bf16 %v2174_v48, %v2171_v8 }
 0xbe1   :  { %3129 = vmatprep.subr.bf16.mxu0 %v4039_v7 }
 0xbec   :  { %v3127_v19 = vpop.f32.mrb[40].mxu1 }
 0xbed   :  { %v2240_v16 = vpop.f32.mrb[41].mxu1  ;;  %v2257_v62 = vmul.f32 0.35355338, %v3127_v19 }
 0xbee   :  { %v3128_v9 = vpop.f32.mrb[42].mxu1  ;;  %v2255_v14 = vmul.f32 0.35355338, %v2240_v16 }
 0xbef   :  { %v2243_v10 = vpop.f32.mrb[43].mxu1  ;;  %v2261_v6 = vadd.f32 %v2257_v62, %v3924_v45  ;;  %v2258_v28 = vmul.f32 0.35355338, %v3128_v9 }
 0xbf0   :  { %v3105_v11 = vpop.f32.mrb[44].mxu0  ;;  %v2259_v63 = vadd.f32 %v2255_v14, %v3913_v40  ;;  %v2256_v0 = vmul.f32 0.35355338, %v2243_v10 }
 0xbf1   :  { %v1994_v47 = vpop.f32.mrb[45].mxu0  ;;  %v2011_v12 = vmul.f32 0.35355338, %v3105_v11  ;;  %v2262_v31 = vadd.f32 %v2258_v28, %v3934_v56 }
 0xbf2   :  { %v2009_v17 = vmul.f32 0.35355338, %v1994_v47  ;;  %v3106_v13 = vpop.f32.mrb[46].mxu0  ;;  %v2263_v3 = vsel %vm109_vm0, %v2259_v63, -inf  ;;  %v2260_v30 = vadd.f32 %v2256_v0, %v3919_v44 }
 0xbf3   :  { %v1997_v15 = vpop.f32.mrb[47].mxu0  ;;  %v2012_v20 = vmul.f32 0.35355338, %v3106_v13  ;;  %v2015_v25 = vadd.f32 %v2011_v12, %v3924_v45  ;;  %v2272_v37 = vsel %vm109_vm0, %v2262_v31, -inf }
 0xbf4   :  { %v2010_v18 = vmul.f32 0.35355338, %v1997_v15  ;;  %v2013_v22 = vadd.f32 %v2009_v17, %v3913_v40  ;;  %v2269_v40 = vsel %vm109_vm0, %v2261_v6, -inf  ;;  %v2266_v35 = vsel %vm109_vm0, %v2260_v30, -inf }
 0xbf5   :  { %v2023_v1 = vsel %vm109_vm0, %v2015_v25, -inf  ;;  %v2016_v4 = vadd.f32 %v2012_v20, %v3934_v56 }
 0xbf6   :  { %v2017_v23 = vsel %vm109_vm0, %v2013_v22, -inf  ;;  %v2014_v21 = vadd.f32 %v2010_v18, %v3919_v44 }
 0xbf7   :  { %2018 = vmax.xlane.f32.xlu0 %v2017_v23  ;;  %v2026_v29 = vsel %vm109_vm0, %v2016_v4, -inf }
 0xbf8   :  { %v2020_v27 = vsel %vm109_vm0, %v2014_v21, -inf }
 0xbf9   :  { %2021 = vmax.xlane.f32.xlu1 %v2020_v27 }
 0xbfb   :  { %2024 = vmax.xlane.f32.xlu0 %v2023_v1 }
 0xbfd   :  { %2264 = vmax.xlane.f32.xlu1 %v2263_v3 }
 0xbff   :  { %2027 = vmax.xlane.f32.xlu0 %v2026_v29 }
 0xc01   :  { %2270 = vmax.xlane.f32.xlu1 %v2269_v40 }
 0xc03   :  { %2267 = vmax.xlane.f32.xlu0 %v2266_v35 }
 0xc07   :  { %2273 = vmax.xlane.f32.xlu0 %v2272_v37 }
 0xc84   :  { %v2019_v38 = vpop.xlane.xlu0 %2018 }
 0xc85   :  { %v2029_v45 = vsub.f32 %v2013_v22, %v2019_v38 }
 0xc86   :  { %v2022_v26 = vpop.xlane.xlu1 %2021 }
 0xc87   :  { %v2033_v39 = vmul.f32 1.442695, %v2029_v45  ;;  %v2030_v41 = vsub.f32 %v2014_v21, %v2022_v26 }
 0xc88   :  { %v2025_v42 = vpop.xlane.xlu0 %2024 }
 0xc89   :  { %3357 = vpow2.f32 %v2033_v39  ;;  %v2035_v44 = vmul.f32 1.442695, %v2030_v41  ;;  %v2031_v43 = vsub.f32 %v2015_v25, %v2025_v42 }
 0xc8a   :  { %v2265_v46 = vpop.xlane.xlu1 %2264 }
 0xc8b   :  { %3359 = vpow2.f32 %v2035_v44  ;;  %v2037_v24 = vmul.f32 1.442695, %v2031_v43  ;;  %v2275_v49 = vsub.f32 %v2259_v63, %v2265_v46 }
 0xc8c   :  { %v2028_v56 = vpop.xlane.xlu0 %2027 }
 0xc8d   :  { %3361 = vpow2.f32 %v2037_v24  ;;  %v2279_v51 = vmul.f32 1.442695, %v2275_v49  ;;  %v2032_v52 = vsub.f32 %v2016_v4, %v2028_v56  ;;  %v3251_v56 = vld [vmem:[%s4159_s15] sm:$0xff]  }
 0xc8e   :  { %v2271_v55 = vpop.xlane.xlu1 %2270 }
 0xc8f   :  { %3363 = vpow2.f32 %v2279_v51  ;;  %v2039_v53 = vmul.f32 1.442695, %v2032_v52  ;;  %v2277_v54 = vsub.f32 %v2261_v6, %v2271_v55 }
 0xc90   :  { %v2268_v58 = vpop.xlane.xlu0 %2267 }
 0xc91   :  { %3365 = vpow2.f32 %v2039_v53  ;;  %v2283_v50 = vmul.f32 1.442695, %v2277_v54  ;;  %v2276_v57 = vsub.f32 %v2260_v30, %v2268_v58 }
 0xc93   :  { %v3358_v59 = vpop.eup %3357  ;;  %3367 = vpow2.f32 %v2283_v50  ;;  %v2281_v60 = vmul.f32 1.442695, %v2276_v57 }
 0xc94   :  { %v2274_v8 = vpop.xlane.xlu0 %2273  ;;  %v2041_v61 = vsel %vm109_vm0, %v3358_v59, 0.0 }
 0xc95   :  { %v3360_v48 = vpop.eup %3359  ;;  %3369 = vpow2.f32 %v2281_v60  ;;  %v2278_v19 = vsub.f32 %v2262_v31, %v2274_v8  ;;  %2042 = vadd.xlane.f32.xlu1 %v2041_v61 }
 0xc96   :  { %v2044_v16 = vsel %vm109_vm0, %v3360_v48, 0.0 }
 0xc97   :  { %v3362_v9 = vpop.eup %3361  ;;  %v2285_v10 = vmul.f32 1.442695, %v2278_v19  ;;  %2045 = vadd.xlane.f32.xlu0 %v2044_v16  ;;  %v3257_v19 = vld [vmem:[%s4161_s17 + $0x20] sm:$0xff]   ;;  %v3258_v16 = vld [vmem:[%s4161_s17 + $0x28] sm:$0xff]  }
 0xc98   :  { %v2047_v11 = vsel %vm109_vm0, %v3362_v9, 0.0 }
 0xc99   :  { %v3364_v47 = vpop.eup %3363  ;;  %3371 = vpow2.f32 %v2285_v10  ;;  %2048 = vadd.xlane.f32.xlu1 %v2047_v11 }
 0xc9a   :  { %v2287_v17 = vsel %vm109_vm0, %v3364_v47, 0.0 }
 0xc9b   :  { %v3366_v12 = vpop.eup %3365 }
 0xc9c   :  { %v2050_v13 = vsel %vm109_vm0, %v3366_v12, 0.0 }
 0xc9d   :  { %v3368_v15 = vpop.eup %3367  ;;  %2288 = vadd.xlane.f32.xlu1 %v2287_v17  ;;  %2051 = vadd.xlane.f32.xlu0 %v2050_v13  ;;  %v3389_v13 = vld [vmem:[%s4174_s27] sm:$0xff]  }
 0xc9e   :  { %v2293_v18 = vsel %vm109_vm0, %v3368_v15, 0.0 }
 0xc9f   :  { %v3370_v14 = vpop.eup %3369 }
 0xca0   :  { %v2290_v22 = vsel %vm109_vm0, %v3370_v14, 0.0 }
 0xca1   :  { %2294 = vadd.xlane.f32.xlu1 %v2293_v18  ;;  %2291 = vadd.xlane.f32.xlu0 %v2290_v22  ;;  %v2787_v18 = vld [vmem:[%s4160_s16] ss:$0 sm:$0xff] }
 0xca3   :  { %v3372_v20 = vpop.eup %3371 }
 0xca4   :  { %v2296_v23 = vsel %vm109_vm0, %v3372_v20, 0.0 }
 0xca5   :  { %2297 = vadd.xlane.f32.xlu0 %v2296_v23 }
 0xd22   :  { %v2043_v21 = vpop.xlane.xlu1 %2042 }
 0xd23   :  { %3373 = vrcp.f32 %v2043_v21 }
 0xd24   :  { %v2046_v25 = vpop.xlane.xlu0 %2045 }
 0xd25   :  { %3375 = vrcp.f32 %v2046_v25 }
 0xd26   :  { %v2049_v62 = vpop.xlane.xlu1 %2048 }
 0xd27   :  { %3377 = vrcp.f32 %v2049_v62 }
 0xd2a   :  { %v2052_v27 = vpop.xlane.xlu0 %2051  ;;  %v2289_v63 = vpop.xlane.xlu1 %2288 }
 0xd2b   :  { %3379 = vrcp.f32 %v2052_v27 }
 0xd2c   :  { %3381 = vrcp.f32 %v2289_v63 }
 0xd2d   :  { %v3374_v0 = vpop.eup %3373 }
 0xd2e   :  { %v2292_v1 = vpop.xlane.xlu0 %2291  ;;  %v2057_v3 = vmul.f32 %v3374_v0, %v3358_v59  ;;  %v2295_v30 = vpop.xlane.xlu1 %2294 }
 0xd2f   :  { %v3376_v4 = vpop.eup %3375  ;;  %3383 = vrcp.f32 %v2292_v1 }
 0xd30   :  { %v2058_v6 = vmul.f32 %v3376_v4, %v3360_v48 }
 0xd31   :  { %v3378_v40 = vpop.eup %3377 }
 0xd32   :  { %v2298_v28 = vpop.xlane.xlu0 %2297  ;;  %v2061_v29 = vpack.c.bf16 %v2058_v6, %v2057_v3  ;;  %v2059_v35 = vmul.f32 %v3378_v40, %v3362_v9 }
 0xd33   :  { %3385 = vrcp.f32 %v2298_v28 }
 0xd34   :  { %3111 = vmatprep.mubr.msk.bf16.mxu0 %vm109_vm0, %v2061_v29  ;;  %3387 = vrcp.f32 %v2295_v30  ;;  %v2792_v29 = vld [vmem:[%s4162_s18] ss:$0 sm:$0xff] }
 0xd35   :  { %v3380_v31 = vpop.eup %3379 }
 0xd36   :  { %v2060_v37 = vmul.f32 %v3380_v31, %v3366_v12  ;;  %v3382_v38 = vpop.eup %3381 }
 0xd37   :  { %v2303_v39 = vmul.f32 %v3382_v38, %v3364_v47 }
 0xd38   :  { %v2062_v45 = vpack.c.bf16 %v2060_v37, %v2059_v35 }
 0xd39   :  { %v3384_v26 = vpop.eup %3383 }
 0xd3a   :  { %3112 = vmatmul.mubr.msk.bf16.vlgmr.msra.gmra.mrb[40].mxu0 %vm109_vm0, %v2062_v45  ;;  %v2304_v41 = vmul.f32 %v3384_v26, %v3370_v14  ;;  %v3260_v14 = vld [vmem:[%s4161_s17 + $0x38] sm:$0xff]  }
 0xd3b   :  { %3130 = vmatpush3.bf16.msra.mxu0 %v4039_v7  ;;  %v2784_v7 = vld [vmem:[%s4158_s14] ss:$0 sm:$0xff] }
 0xd3c   :  { %3131 = vmatprep.subr.bf16.mxu0 %v4037_v5  ;;  %v2307_v42 = vpack.c.bf16 %v2304_v41, %v2303_v39 }
 0xd3d   :  { %v3386_v44 = vpop.eup %3385 }
 0xd3e   :  { %3133 = vmatprep.mubr.msk.bf16.mxu0 %vm109_vm0, %v2307_v42  ;;  %v3388_v43 = vpop.eup %3387  ;;  %v2306_v46 = vmul.f32 %v3386_v44, %v3372_v20 }
 0xd3f   :  { %3132 = vmatpush3.bf16.msra.mxu0 %v4037_v5  ;;  %v2305_v24 = vmul.f32 %v3388_v43, %v3368_v15  ;;  %v3259_v15 = vld [vmem:[%s4161_s17 + $0x30] sm:$0xff]  }
 0xd40   :  { %3145 = vmatprep.subr.bf16.mxu0 %v3251_v56 }
 0xd41   :  { %v2308_v49 = vpack.c.bf16 %v2306_v46, %v2305_v24  ;;  %v3390_v24 = vld [vmem:[%s4174_s27 + $0x8] sm:$0xff]  }
 0xd46   :  { %3134 = vmatmul.mubr.msk.bf16.vlgmr.msra.gmra.mrb[40].mxu0 %vm109_vm0, %v2308_v49 }
 0xd47   :  { %3146 = vmatpush3.bf16.msra.mxu0 %v3251_v56 }
 0xe19   :  { %v3135_v51 = vpop.f32.mrb[40].mxu0 }
 0xe1a   :  { %v2378_v52 = vadd.f32 %v3135_v51, %v2784_v7  ;;  %v2351_v55 = vpop.f32.mrb[41].mxu0 }
 0xe1b   :  { %v2376_v53 = vadd.f32 %v2784_v7, %v2351_v55  ;;  %v3136_v5 = vpop.f32.mrb[42].mxu0 }
 0xe1c   :  { %v2382_v54 = vadd.f32 %v3829_v32, %v2378_v52  ;;  %v2379_v58 = vadd.f32 %v3136_v5, %v2784_v7  ;;  %v2354_v50 = vpop.f32.mrb[43].mxu0  ;;  %v3252_v32 = vld [vmem:[%s4159_s15 + $0x8] sm:$0xff]  }
 0xe1d   :  { %v2380_v57 = vadd.f32 %v2376_v53, %v3831_v33  ;;  %v2377_v59 = vadd.f32 %v2784_v7, %v2354_v50  ;;  %3147 = vmatprep.subr.bf16.mxu0 %v3252_v32  ;;  %v3253_v33 = vld [vmem:[%s4161_s17] sm:$0xff]  }
 0xe1e   :  { %v2383_v60 = vadd.f32 %v3833_v34, %v2379_v58  ;;  %3148 = vmatpush3.bf16.msra.mxu0 %v3252_v32  ;;  %v3254_v34 = vld [vmem:[%s4161_s17 + $0x8] sm:$0xff]  }
 0xe1f   :  { %v2381_v8 = vadd.f32 %v2377_v59, %v3837_v36  ;;  %v3256_v36 = vld [vmem:[%s4161_s17 + $0x18] sm:$0xff]  }
 0xe20   :  { %v2385_v61 = vpack.c.bf16 %v2383_v60, %v2382_v54 }
 0xe21   :  { %v2384_v48 = vpack.c.bf16 %v2381_v8, %v2380_v57 }
 0xe23   :  { %3137 = vmatprep.subr.bf16.mxu1 %v2384_v48 }
 0xe24   :  { %3138 = vmatpush3.bf16.msra.mxu1 %v2384_v48 }
 0xe25   :  { %3139 = vmatprep.subr.bf16.mxu1 %v2385_v61 }
 0xe28   :  { %3140 = vmatpush3.bf16.msra.mxu1 %v2385_v61 }
 0xe29   :  { %3153 = vmatprep.subr.bf16.mxu1 %v3253_v33 }
 0xe2b   :  { %3142 = vmatmul.mubr.msk.bf16.vlgmr.msra.gmra.mrb[44].mxu1 %vm109_vm0, %v3811_v2  ;;  %v3255_v2 = vld [vmem:[%s4161_s17 + $0x10] sm:$0xff]  }
 0xe2c   :  { %3154 = vmatpush3.bf16.msra.mxu1 %v3253_v33 }
 0xe2d   :  { %3155 = vmatprep.subr.bf16.mxu1 %v3254_v34 }
 0xe30   :  { %3156 = vmatpush3.bf16.msra.mxu1 %v3254_v34 }
 0xe31   :  { %3157 = vmatprep.subr.bf16.mxu1 %v3255_v2 }
 0xe34   :  { %3158 = vmatpush3.bf16.msra.mxu1 %v3255_v2 }
 0xe35   :  { %3159 = vmatprep.subr.bf16.mxu1 %v3256_v36 }
 0xe38   :  { %3160 = vmatpush3.bf16.msra.mxu1 %v3256_v36 }
 0xe39   :  { %3161 = vmatprep.subr.bf16.mxu1 %v3257_v19 }
 0xe3c   :  { %3162 = vmatpush3.bf16.msra.mxu1 %v3257_v19 }
 0xe3d   :  { %3163 = vmatprep.subr.bf16.mxu1 %v3258_v16 }
 0xe40   :  { %3164 = vmatpush3.bf16.msra.mxu1 %v3258_v16 }
 0xe41   :  { %3165 = vmatprep.subr.bf16.mxu1 %v3259_v15 }
 0xe44   :  { %3166 = vmatpush3.bf16.msra.mxu1 %v3259_v15 }
 0xe45   :  { %3167 = vmatprep.subr.bf16.mxu1 %v3260_v14 }
 0xe48   :  { %3168 = vmatpush3.bf16.msra.mxu1 %v3260_v14 }
 0xefe   :  { %v3143_v9 = vpop.f32.mrb[44].mxu1 }
 0xeff   :  { %v2420_v10 = vpop.f32.mrb[45].mxu1 }
 0xf00   :  { %v3144_v11 = vpop.f32.mrb[46].mxu1 }
 0xf01   :  { %v2440_v47 = vpack.c.bf16 %v3144_v11, %v3143_v9  ;;  %v2423_v12 = vpop.f32.mrb[47].mxu1 }
 0xf02   :  { %v2439_v17 = vpack.c.bf16 %v2423_v12, %v2420_v10 }
 0xf04   :  { %3149 = vmatprep.mubr.msk.bf16.mxu0 %vm109_vm0, %v2439_v17 }
 0xf05   :  { %3150 = vmatmul.mubr.msk.bf16.vlgmr.msra.gmra.mrb[48].mxu0 %vm109_vm0, %v2440_v47 }
 0xf06   :  { %3177 = vmatprep.mubr.msk.bf16.mxu0 %vm109_vm0, %v3389_v13 }
 0xfd8   :  { %v3151_v22 = vpop.f32.mrb[48].mxu0 }
 0xfd9   :  { %v2509_v20 = vadd.f32 %v3151_v22, %v2787_v18  ;;  %v2500_v23 = vpop.f32.mrb[49].mxu0 }
 0xfda   :  { %v2501_v21 = vadd.f32 %v2787_v18, %v2500_v23  ;;  %v3152_v25 = vpop.f32.mrb[50].mxu0 }
 0xfdb   :  { %v2512_v62 = vadd.f32 %v3152_v25, %v2787_v18  ;;  %v2503_v27 = vpop.f32.mrb[51].mxu0  ;;  %v2517_v0 = vmax.f32 %v2509_v20, 0.0 }
 0xfdc   :  { %v2504_v63 = vadd.f32 %v2787_v18, %v2503_v27  ;;  %v2515_v4 = vmax.f32 %v2501_v21, 0.0 }
 0xfdd   :  { %v2518_v1 = vmax.f32 %v2512_v62, 0.0 }
 0xfde   :  { %v2516_v3 = vmax.f32 %v2504_v63, 0.0 }
 0xfdf   :  { %v2536_v6 = vpack.c.bf16 %v2518_v1, %v2517_v0 }
 0xfe0   :  { %v2535_v28 = vpack.c.bf16 %v2516_v3, %v2515_v4 }
 0xfe2   :  { %3169 = vmatprep.mubr.bf16.mxu1 %v2535_v28 }
 0xfe3   :  { %3170 = vmatmul.mubr.bf16.vlgmr.msra.gmra.mrb[48].mxu1 %v2536_v6 }
0x10b6   :  { %v3171_v30 = vpop.f32.mrb[48].mxu1 }
0x10b7   :  { %v2635_v40 = vadd.f32 %v3171_v30, %v2792_v29  ;;  %v2626_v31 = vpop.f32.mrb[49].mxu1 }
0x10b8   :  { %v2627_v35 = vadd.f32 %v2792_v29, %v2626_v31  ;;  %v3172_v37 = vpop.f32.mrb[50].mxu1 }
0x10b9   :  { %v2643_v38 = vadd.f32 %v3143_v9, %v2635_v40  ;;  %v2638_v45 = vadd.f32 %v3172_v37, %v2792_v29  ;;  %v2629_v26 = vpop.f32.mrb[51].mxu1 }
0x10ba   :  { %v2641_v39 = vadd.f32 %v2627_v35, %v2420_v10  ;;  %v2630_v41 = vadd.f32 %v2792_v29, %v2629_v26 }
0x10bb   :  { %v2644_v42 = vadd.f32 %v3144_v11, %v2638_v45 }
0x10bc   :  { %v2642_v44 = vadd.f32 %v2630_v41, %v2423_v12 }
0x10bd   :  { %v2646_v43 = vpack.c.bf16 %v2644_v42, %v2643_v38 }
0x10be   :  { %v2645_v46 = vpack.c.bf16 %v2642_v44, %v2641_v39 }
0x10c0   :  { %3173 = vmatprep.subr.bf16.mxu0 %v2645_v46 }
0x10c1   :  { %3174 = vmatpush3.bf16.msra.mxu0 %v2645_v46 }
0x10c2   :  { %3175 = vmatprep.subr.bf16.mxu0 %v2646_v43 }
0x10c5   :  { %3176 = vmatpush3.bf16.msra.mxu0 %v2646_v43 }
0x10c8   :  { %3178 = vmatmul.mubr.msk.bf16.vlgmr.msra.gmra.mrb[52].mxu0 %vm109_vm0, %v3390_v24 }
0x119b   :  { %v3179_v49 = vpop.f32.mrb[52].mxu0 }
0x119c   :  { %2698 = vst.msk [vmem:[#allocation2 + $0x10] sm:$0xff] %vm109_vm0, %v3179_v49  ;;  %v2681_v56 = vpop.f32.mrb[53].mxu0 }
0x119d   :  { %2696 = vst.msk [vmem:[#allocation2] sm:$0xff] %vm109_vm0, %v2681_v56  ;;  %v3180_v7 = vpop.f32.mrb[54].mxu0 }
0x119e   :  { %2699 = vst.msk [vmem:[#allocation2 + $0x18] sm:$0xff] %vm109_vm0, %v3180_v7  ;;  %v2684_v51 = vpop.f32.mrb[55].mxu0 }
0x119f   :  { %2697 = vst.msk [vmem:[#allocation2 + $0x8] sm:$0xff] %vm109_vm0, %v2684_v51 }
0x11a0   :  { %3402 = shalt.err (!%p3399_p4)
}
0x11a1   :  { %s3403_s25 = scalar_lea.hbm %s4163_s19, 512 }
0x11a2   :  { %p3404_p5 = scmp.ne.s32.totalorder %s4163_s19, %s3403_s25  ;;  %p3407_p6 = scmp.lt.u32.totalorder %s3403_s25, %s4163_s19 }
0x11a4   :  { %p3409_p7 = pnand %p3407_p6, %p3404_p5 }
0x11a6   :  { %3412 = shalt.err (!%p3409_p7)
}
0x11a7   :  { %s3427_s28 = smov 128   ;;  %s3428_s6 = smov 8  }
0x11a8   :  { %2711 = dma.vmem_to_hbm [thread:$0]  %s2706_s23, 512, %s4163_s19, [#allocation3], %s3427_s28, %s3427_s28, %s3428_s6  }
0x11a9   :  { %3413 = dma.done.wait [#allocation3], 512  }
0x11aa   :  { %3414 = vsyncadd [#allocation3], 4294966784 }
0x11ab   :  { %2715 = vsyncpa [#allocation3], 1 }

</bundles_post_ra>
